<compile_context>
chip_gen: v6e
topology: v6e:2x2x1
jax: 0.10.0
libtpu: 0.0.40
codegen_flags: <defaults>
</compile_context>

<pallas_src>
import functools

import jax
import jax.numpy as jnp
import numpy as np
from jax.experimental import pallas as pl
from jax.experimental.pallas import tpu as pltpu


def _fused_lstm_kernel(x_ref, wih_ref, whh_ref, b_ref, out_ref, *, T, B, H, L):
    """All LSTM layers, all timesteps, in one invocation.

    x_ref:   (T*B, H)    time-major flattened input sequence
    wih_ref: (L, H, 4H)  pre-transposed input->gates weights
    whh_ref: (L, H, 4H)  pre-transposed hidden->gates weights
    b_ref:   (L, 1, 4H)  fused biases (b_ih + b_hh)
    out_ref: (T*B, H)    final layer's hidden sequence
    """
    x = x_ref[...].astype(jnp.float32)                      # (T*B, H)

    # Column scale implementing sigmoid(z) = 0.5*(tanh(z/2) + 1) for the
    # i/f/o gates: scale those gate columns by 0.5 so ONE tanh over the whole
    # (B, 4H) slab evaluates all four gate nonlinearities.
    scale = jnp.concatenate(
        [jnp.full((1, 2 * H), 0.5, jnp.float32),   # i, f
         jnp.ones((1, H), jnp.float32),            # g (plain tanh)
         jnp.full((1, H), 0.5, jnp.float32)],      # o
        axis=1)                                    # (1, 4H)

    for layer in range(L):
        wih = wih_ref[layer]                                # (H, 4H)
        whh_s = whh_ref[layer] * scale                      # (H, 4H), pre-scaled
        b = b_ref[layer]                                    # (1, 4H)

        # Hoisted input projection: one batched MXU call per layer, with the
        # sigmoid half-scale and the fused bias folded in.
        gates_x = (jnp.dot(x, wih, preferred_element_type=jnp.float32) + b) * scale

        h = jnp.zeros((B, H), jnp.float32)
        c = jnp.zeros((B, H), jnp.float32)
        hs = []

        # Fully-unrolled recurrence (T is small and static).
        for t in range(T):
            g = gates_x[t * B:(t + 1) * B, :] + jnp.dot(
                h, whh_s, preferred_element_type=jnp.float32)   # (B, 4H)

            tg = jnp.tanh(g)                                 # 1 EUP push, all gates
            i_g = 0.5 * (tg[:, 0 * H:1 * H] + 1.0)           # sigmoid(i)
            f_g = 0.5 * (tg[:, 1 * H:2 * H] + 1.0)           # sigmoid(f)
            g_g = tg[:, 2 * H:3 * H]                         # tanh(g)
            o_g = 0.5 * (tg[:, 3 * H:4 * H] + 1.0)           # sigmoid(o)

            c = f_g * c + i_g * g_g
            h = o_g * jnp.tanh(c)                            # 2nd EUP push
            hs.append(h)

        # Next layer consumes the sequence just produced; keep it in vregs.
        x = jnp.concatenate(hs, axis=0)                      # (T*B, H)

    # Single HBM writeback of the final layer's hidden sequence.
    out_ref[...] = x.astype(out_ref.dtype)


@jax.jit
def residual_adapter_forward(latent_code, wih_all, whh_all, bias_all):
    """latent_code: (B, T, H) batch-first. Returns neutral_output (B, T, H)."""
    B, T, H = latent_code.shape
    L = wih_all.shape[0]

    # Batch-first -> time-major, flattened to a single (T*B, H) slab.
    x_tm = jnp.transpose(latent_code, (1, 0, 2)).reshape(T * B, H)

    kernel = functools.partial(_fused_lstm_kernel, T=T, B=B, H=H, L=L)

    out_flat = pl.pallas_call(
        kernel,
        out_shape=jax.ShapeDtypeStruct((T * B, H), latent_code.dtype),
        grid=(1,),
        in_specs=[
            pl.BlockSpec((T * B, H), lambda i: (0, 0)),          # x (whole seq)
            pl.BlockSpec((L, H, 4 * H), lambda i: (0, 0, 0)),    # W_ih^T, all layers
            pl.BlockSpec((L, H, 4 * H), lambda i: (0, 0, 0)),    # W_hh^T, all layers
            pl.BlockSpec((L, 1, 4 * H), lambda i: (0, 0, 0)),    # fused biases
        ],
        out_specs=pl.BlockSpec((T * B, H), lambda i: (0, 0)),
        compiler_params=pltpu.CompilerParams(
            dimension_semantics=("arbitrary",),
        ),
    )(x_tm, wih_all, whh_all, bias_all)

    return jnp.transpose(out_flat.reshape(T, B, H), (1, 0, 2))


def make_lstm_params(key, num_layers, hidden):
    """Deterministic init mimicking PyTorch nn.LSTM's U(-1/sqrt(H), 1/sqrt(H)).

    Returns stacked, pre-transposed weights:
      wih_all (L, H, 4H), whh_all (L, H, 4H), bias_all (L, 1, 4H)
    """
    bound = 1.0 / np.sqrt(hidden)
    wih, whh, bias = [], [], []
    for _ in range(num_layers):
        key, k1, k2, k3, k4 = jax.random.split(key, 5)
        w_ih = jax.random.uniform(k1, (4 * hidden, hidden), jnp.float32, -bound, bound)
        w_hh = jax.random.uniform(k2, (4 * hidden, hidden), jnp.float32, -bound, bound)
        b_ih = jax.random.uniform(k3, (4 * hidden,), jnp.float32, -bound, bound)
        b_hh = jax.random.uniform(k4, (4 * hidden,), jnp.float32, -bound, bound)
        wih.append(w_ih.T)
        whh.append(w_hh.T)
        bias.append((b_ih + b_hh).reshape(1, 4 * hidden))
    return jnp.stack(wih), jnp.stack(whh), jnp.stack(bias)


def lstm_reference(latent_code, wih_all, whh_all, bias_all):
    """Pure-JAX reference (lax.scan) with identical PyTorch LSTM semantics."""
    x = jnp.transpose(latent_code, (1, 0, 2))  # (T, B, H)
    L, H, _ = wih_all.shape
    B = x.shape[1]
    for l in range(L):
        wih_t, whh_t, b = wih_all[l], whh_all[l], bias_all[l]

        def step(carry, x_t, wih_t=wih_t, whh_t=whh_t, b=b):
            h, c = carry
            gates = x_t @ wih_t + h @ whh_t + b
            i = jax.nn.sigmoid(gates[:, 0 * H:1 * H])
            f = jax.nn.sigmoid(gates[:, 1 * H:2 * H])
            g = jnp.tanh(gates[:, 2 * H:3 * H])
            o = jax.nn.sigmoid(gates[:, 3 * H:4 * H])
            c_new = f * c + i * g
            h_new = o * jnp.tanh(c_new)
            return (h_new, c_new), h_new

        init = (jnp.zeros((B, H), jnp.float32), jnp.zeros((B, H), jnp.float32))
        _, x = jax.lax.scan(step, init, x)
    return jnp.transpose(x, (1, 0, 2))


if __name__ == "__main__":
    # args.latent_dim = 24 -> LSTM hidden/input size = latent_dim + 8 = 32
    # args.neutral_layer_num = 2, batch = 2, seq = 8
    latent_dim = 24
    hidden = latent_dim + 8
    num_layers = 2
    batch, seq = 2, 8

    key = jax.random.PRNGKey(0)
    key, xk = jax.random.split(key)
    latent_code = jax.random.normal(xk, (batch, seq, hidden), jnp.float32)

    wih_all, whh_all, bias_all = make_lstm_params(key, num_layers, hidden)

    out = residual_adapter_forward(latent_code, wih_all, whh_all, bias_all)
    out = jax.block_until_ready(out)

    ref = jax.block_until_ready(lstm_reference(latent_code, wih_all, whh_all, bias_all))
    np.testing.assert_allclose(np.asarray(out), np.asarray(ref), rtol=2e-5, atol=2e-5)

    print("KERNEL_OK")
</pallas_src>

<mosaic_0001>
module attributes {stable_mosaic.version = 11 : i64} {
  func.func @_fused_lstm_kernel(%arg0: i32, %arg1: memref<16x32xf32, #tpu.memory_space<vmem>>, %arg2: memref<2x32x128xf32, #tpu.memory_space<vmem>>, %arg3: memref<2x32x128xf32, #tpu.memory_space<vmem>>, %arg4: memref<2x1x128xf32, #tpu.memory_space<vmem>>, %arg5: memref<16x32xf32, #tpu.memory_space<vmem>>) attributes {dimension_semantics = [#tpu.dimension_semantics<arbitrary>], iteration_bounds = array<i64: 1>, scalar_prefetch = 0 : i64, scratch_operands = 0 : i64, tpu.core_type = #tpu.core_type<tc>, window_params = [{pipeline_mode = #tpu.pipeline_mode<synchronous>, transform_indices = @transform_0, window_bounds = array<i64: 16, 32>}, {pipeline_mode = #tpu.pipeline_mode<synchronous>, transform_indices = @transform_1, window_bounds = array<i64: 2, 32, 128>}, {pipeline_mode = #tpu.pipeline_mode<synchronous>, transform_indices = @transform_2, window_bounds = array<i64: 2, 32, 128>}, {pipeline_mode = #tpu.pipeline_mode<synchronous>, transform_indices = @transform_3, window_bounds = array<i64: 2, 1, 128>}, {pipeline_mode = #tpu.pipeline_mode<synchronous>, transform_indices = @transform_4, window_bounds = array<i64: 16, 32>}]} {
    %c0 = arith.constant 0 : index
    %c0_0 = arith.constant 0 : index
    %0 = vector.load %arg1[%c0, %c0_0] : memref<16x32xf32, #tpu.memory_space<vmem>>, vector<16x32xf32>
    %cst = arith.constant 5.000000e-01 : f32
    %1 = vector.broadcast %cst : f32 to vector<1x64xf32>
    %cst_1 = arith.constant 1.000000e+00 : f32
    %2 = vector.broadcast %cst_1 : f32 to vector<1x32xf32>
    %cst_2 = arith.constant 5.000000e-01 : f32
    %3 = vector.broadcast %cst_2 : f32 to vector<1x32xf32>
    %4 = tpu.concatenate %1, %2, %3 in 1 : vector<1x64xf32>, vector<1x32xf32>, vector<1x32xf32> -> vector<1x128xf32>
    %c0_3 = arith.constant 0 : index
    %c0_4 = arith.constant 0 : index
    %c0_5 = arith.constant 0 : index
    %5 = vector.load %arg2[%c0_3, %c0_4, %c0_5] : memref<2x32x128xf32, #tpu.memory_space<vmem>>, vector<1x32x128xf32>
    %6 = vector.shape_cast %5 : vector<1x32x128xf32> to vector<32x128xf32>
    %c0_6 = arith.constant 0 : index
    %c0_7 = arith.constant 0 : index
    %c0_8 = arith.constant 0 : index
    %7 = vector.load %arg3[%c0_6, %c0_7, %c0_8] : memref<2x32x128xf32, #tpu.memory_space<vmem>>, vector<1x32x128xf32>
    %8 = vector.shape_cast %7 : vector<1x32x128xf32> to vector<32x128xf32>
    %9 = vector.broadcast %4 : vector<1x128xf32> to vector<32x128xf32>
    %10 = arith.mulf %8, %9 : vector<32x128xf32>
    %c0_9 = arith.constant 0 : index
    %c0_10 = arith.constant 0 : index
    %c0_11 = arith.constant 0 : index
    %11 = vector.load %arg4[%c0_9, %c0_10, %c0_11] : memref<2x1x128xf32, #tpu.memory_space<vmem>>, vector<1x1x128xf32>
    %12 = vector.shape_cast %11 : vector<1x1x128xf32> to vector<1x128xf32>
    %cst_12 = arith.constant dense<0.000000e+00> : vector<16x128xf32>
    %13 = tpu.matmul %0, %6, %cst_12 {dimension_numbers = #tpu.dot_dimension_numbers<[1], [0], [0], [1], [0, 0, 1, 1], [], []>} : vector<16x32xf32>, vector<32x128xf32>, vector<16x128xf32> -> vector<16x128xf32>
    %14 = vector.broadcast %12 : vector<1x128xf32> to vector<16x128xf32>
    %15 = arith.addf %13, %14 : vector<16x128xf32>
    %16 = vector.broadcast %4 : vector<1x128xf32> to vector<16x128xf32>
    %17 = arith.mulf %15, %16 : vector<16x128xf32>
    %cst_13 = arith.constant 0.000000e+00 : f32
    %18 = vector.broadcast %cst_13 : f32 to vector<2x32xf32>
    %cst_14 = arith.constant 0.000000e+00 : f32
    %19 = vector.broadcast %cst_14 : f32 to vector<2x32xf32>
    %20 = vector.extract_strided_slice %17 {offsets = [0, 0], sizes = [2, 128], strides = [1, 1]} : vector<16x128xf32> to vector<2x128xf32>
    %cst_15 = arith.constant dense<0.000000e+00> : vector<2x128xf32>
    %21 = tpu.matmul %18, %10, %cst_15 {dimension_numbers = #tpu.dot_dimension_numbers<[1], [0], [0], [1], [0, 0, 1, 1], [], []>} : vector<2x32xf32>, vector<32x128xf32>, vector<2x128xf32> -> vector<2x128xf32>
    %22 = arith.addf %20, %21 : vector<2x128xf32>
    %23 = math.tanh %22 : vector<2x128xf32>
    %24 = vector.extract_strided_slice %23 {offsets = [0, 0], sizes = [2, 32], strides = [1, 1]} : vector<2x128xf32> to vector<2x32xf32>
    %cst_16 = arith.constant 1.000000e+00 : f32
    %25 = vector.broadcast %cst_16 : f32 to vector<2x32xf32>
    %26 = arith.addf %24, %25 : vector<2x32xf32>
    %cst_17 = arith.constant 5.000000e-01 : f32
    %27 = vector.broadcast %cst_17 : f32 to vector<2x32xf32>
    %28 = arith.mulf %27, %26 : vector<2x32xf32>
    %29 = vector.extract_strided_slice %23 {offsets = [0, 32], sizes = [2, 32], strides = [1, 1]} : vector<2x128xf32> to vector<2x32xf32>
    %cst_18 = arith.constant 1.000000e+00 : f32
    %30 = vector.broadcast %cst_18 : f32 to vector<2x32xf32>
    %31 = arith.addf %29, %30 : vector<2x32xf32>
    %cst_19 = arith.constant 5.000000e-01 : f32
    %32 = vector.broadcast %cst_19 : f32 to vector<2x32xf32>
    %33 = arith.mulf %32, %31 : vector<2x32xf32>
    %34 = vector.extract_strided_slice %23 {offsets = [0, 64], sizes = [2, 32], strides = [1, 1]} : vector<2x128xf32> to vector<2x32xf32>
    %35 = vector.extract_strided_slice %23 {offsets = [0, 96], sizes = [2, 32], strides = [1, 1]} : vector<2x128xf32> to vector<2x32xf32>
    %cst_20 = arith.constant 1.000000e+00 : f32
    %36 = vector.broadcast %cst_20 : f32 to vector<2x32xf32>
    %37 = arith.addf %35, %36 : vector<2x32xf32>
    %cst_21 = arith.constant 5.000000e-01 : f32
    %38 = vector.broadcast %cst_21 : f32 to vector<2x32xf32>
    %39 = arith.mulf %38, %37 : vector<2x32xf32>
    %40 = arith.mulf %33, %19 : vector<2x32xf32>
    %41 = arith.mulf %28, %34 : vector<2x32xf32>
    %42 = arith.addf %40, %41 : vector<2x32xf32>
    %43 = math.tanh %42 : vector<2x32xf32>
    %44 = arith.mulf %39, %43 : vector<2x32xf32>
    %45 = vector.extract_strided_slice %17 {offsets = [2, 0], sizes = [2, 128], strides = [1, 1]} : vector<16x128xf32> to vector<2x128xf32>
    %cst_22 = arith.constant dense<0.000000e+00> : vector<2x128xf32>
    %46 = tpu.matmul %44, %10, %cst_22 {dimension_numbers = #tpu.dot_dimension_numbers<[1], [0], [0], [1], [0, 0, 1, 1], [], []>} : vector<2x32xf32>, vector<32x128xf32>, vector<2x128xf32> -> vector<2x128xf32>
    %47 = arith.addf %45, %46 : vector<2x128xf32>
    %48 = math.tanh %47 : vector<2x128xf32>
    %49 = vector.extract_strided_slice %48 {offsets = [0, 0], sizes = [2, 32], strides = [1, 1]} : vector<2x128xf32> to vector<2x32xf32>
    %cst_23 = arith.constant 1.000000e+00 : f32
    %50 = vector.broadcast %cst_23 : f32 to vector<2x32xf32>
    %51 = arith.addf %49, %50 : vector<2x32xf32>
    %cst_24 = arith.constant 5.000000e-01 : f32
    %52 = vector.broadcast %cst_24 : f32 to vector<2x32xf32>
    %53 = arith.mulf %52, %51 : vector<2x32xf32>
    %54 = vector.extract_strided_slice %48 {offsets = [0, 32], sizes = [2, 32], strides = [1, 1]} : vector<2x128xf32> to vector<2x32xf32>
    %cst_25 = arith.constant 1.000000e+00 : f32
    %55 = vector.broadcast %cst_25 : f32 to vector<2x32xf32>
    %56 = arith.addf %54, %55 : vector<2x32xf32>
    %cst_26 = arith.constant 5.000000e-01 : f32
    %57 = vector.broadcast %cst_26 : f32 to vector<2x32xf32>
    %58 = arith.mulf %57, %56 : vector<2x32xf32>
    %59 = vector.extract_strided_slice %48 {offsets = [0, 64], sizes = [2, 32], strides = [1, 1]} : vector<2x128xf32> to vector<2x32xf32>
    %60 = vector.extract_strided_slice %48 {offsets = [0, 96], sizes = [2, 32], strides = [1, 1]} : vector<2x128xf32> to vector<2x32xf32>
    %cst_27 = arith.constant 1.000000e+00 : f32
    %61 = vector.broadcast %cst_27 : f32 to vector<2x32xf32>
    %62 = arith.addf %60, %61 : vector<2x32xf32>
    %cst_28 = arith.constant 5.000000e-01 : f32
    %63 = vector.broadcast %cst_28 : f32 to vector<2x32xf32>
    %64 = arith.mulf %63, %62 : vector<2x32xf32>
    %65 = arith.mulf %58, %42 : vector<2x32xf32>
    %66 = arith.mulf %53, %59 : vector<2x32xf32>
    %67 = arith.addf %65, %66 : vector<2x32xf32>
    %68 = math.tanh %67 : vector<2x32xf32>
    %69 = arith.mulf %64, %68 : vector<2x32xf32>
    %70 = vector.extract_strided_slice %17 {offsets = [4, 0], sizes = [2, 128], strides = [1, 1]} : vector<16x128xf32> to vector<2x128xf32>
    %cst_29 = arith.constant dense<0.000000e+00> : vector<2x128xf32>
    %71 = tpu.matmul %69, %10, %cst_29 {dimension_numbers = #tpu.dot_dimension_numbers<[1], [0], [0], [1], [0, 0, 1, 1], [], []>} : vector<2x32xf32>, vector<32x128xf32>, vector<2x128xf32> -> vector<2x128xf32>
    %72 = arith.addf %70, %71 : vector<2x128xf32>
    %73 = math.tanh %72 : vector<2x128xf32>
    %74 = vector.extract_strided_slice %73 {offsets = [0, 0], sizes = [2, 32], strides = [1, 1]} : vector<2x128xf32> to vector<2x32xf32>
    %cst_30 = arith.constant 1.000000e+00 : f32
    %75 = vector.broadcast %cst_30 : f32 to vector<2x32xf32>
    %76 = arith.addf %74, %75 : vector<2x32xf32>
    %cst_31 = arith.constant 5.000000e-01 : f32
    %77 = vector.broadcast %cst_31 : f32 to vector<2x32xf32>
    %78 = arith.mulf %77, %76 : vector<2x32xf32>
    %79 = vector.extract_strided_slice %73 {offsets = [0, 32], sizes = [2, 32], strides = [1, 1]} : vector<2x128xf32> to vector<2x32xf32>
    %cst_32 = arith.constant 1.000000e+00 : f32
    %80 = vector.broadcast %cst_32 : f32 to vector<2x32xf32>
    %81 = arith.addf %79, %80 : vector<2x32xf32>
    %cst_33 = arith.constant 5.000000e-01 : f32
    %82 = vector.broadcast %cst_33 : f32 to vector<2x32xf32>
    %83 = arith.mulf %82, %81 : vector<2x32xf32>
    %84 = vector.extract_strided_slice %73 {offsets = [0, 64], sizes = [2, 32], strides = [1, 1]} : vector<2x128xf32> to vector<2x32xf32>
    %85 = vector.extract_strided_slice %73 {offsets = [0, 96], sizes = [2, 32], strides = [1, 1]} : vector<2x128xf32> to vector<2x32xf32>
    %cst_34 = arith.constant 1.000000e+00 : f32
    %86 = vector.broadcast %cst_34 : f32 to vector<2x32xf32>
    %87 = arith.addf %85, %86 : vector<2x32xf32>
    %cst_35 = arith.constant 5.000000e-01 : f32
    %88 = vector.broadcast %cst_35 : f32 to vector<2x32xf32>
    %89 = arith.mulf %88, %87 : vector<2x32xf32>
    %90 = arith.mulf %83, %67 : vector<2x32xf32>
    %91 = arith.mulf %78, %84 : vector<2x32xf32>
    %92 = arith.addf %90, %91 : vector<2x32xf32>
    %93 = math.tanh %92 : vector<2x32xf32>
    %94 = arith.mulf %89, %93 : vector<2x32xf32>
    %95 = vector.extract_strided_slice %17 {offsets = [6, 0], sizes = [2, 128], strides = [1, 1]} : vector<16x128xf32> to vector<2x128xf32>
    %cst_36 = arith.constant dense<0.000000e+00> : vector<2x128xf32>
    %96 = tpu.matmul %94, %10, %cst_36 {dimension_numbers = #tpu.dot_dimension_numbers<[1], [0], [0], [1], [0, 0, 1, 1], [], []>} : vector<2x32xf32>, vector<32x128xf32>, vector<2x128xf32> -> vector<2x128xf32>
    %97 = arith.addf %95, %96 : vector<2x128xf32>
    %98 = math.tanh %97 : vector<2x128xf32>
    %99 = vector.extract_strided_slice %98 {offsets = [0, 0], sizes = [2, 32], strides = [1, 1]} : vector<2x128xf32> to vector<2x32xf32>
    %cst_37 = arith.constant 1.000000e+00 : f32
    %100 = vector.broadcast %cst_37 : f32 to vector<2x32xf32>
    %101 = arith.addf %99, %100 : vector<2x32xf32>
    %cst_38 = arith.constant 5.000000e-01 : f32
    %102 = vector.broadcast %cst_38 : f32 to vector<2x32xf32>
    %103 = arith.mulf %102, %101 : vector<2x32xf32>
    %104 = vector.extract_strided_slice %98 {offsets = [0, 32], sizes = [2, 32], strides = [1, 1]} : vector<2x128xf32> to vector<2x32xf32>
    %cst_39 = arith.constant 1.000000e+00 : f32
    %105 = vector.broadcast %cst_39 : f32 to vector<2x32xf32>
    %106 = arith.addf %104, %105 : vector<2x32xf32>
    %cst_40 = arith.constant 5.000000e-01 : f32
    %107 = vector.broadcast %cst_40 : f32 to vector<2x32xf32>
    %108 = arith.mulf %107, %106 : vector<2x32xf32>
    %109 = vector.extract_strided_slice %98 {offsets = [0, 64], sizes = [2, 32], strides = [1, 1]} : vector<2x128xf32> to vector<2x32xf32>
    %110 = vector.extract_strided_slice %98 {offsets = [0, 96], sizes = [2, 32], strides = [1, 1]} : vector<2x128xf32> to vector<2x32xf32>
    %cst_41 = arith.constant 1.000000e+00 : f32
    %111 = vector.broadcast %cst_41 : f32 to vector<2x32xf32>
    %112 = arith.addf %110, %111 : vector<2x32xf32>
    %cst_42 = arith.constant 5.000000e-01 : f32
    %113 = vector.broadcast %cst_42 : f32 to vector<2x32xf32>
    %114 = arith.mulf %113, %112 : vector<2x32xf32>
    %115 = arith.mulf %108, %92 : vector<2x32xf32>
    %116 = arith.mulf %103, %109 : vector<2x32xf32>
    %117 = arith.addf %115, %116 : vector<2x32xf32>
    %118 = math.tanh %117 : vector<2x32xf32>
    %119 = arith.mulf %114, %118 : vector<2x32xf32>
    %120 = vector.extract_strided_slice %17 {offsets = [8, 0], sizes = [2, 128], strides = [1, 1]} : vector<16x128xf32> to vector<2x128xf32>
    %cst_43 = arith.constant dense<0.000000e+00> : vector<2x128xf32>
    %121 = tpu.matmul %119, %10, %cst_43 {dimension_numbers = #tpu.dot_dimension_numbers<[1], [0], [0], [1], [0, 0, 1, 1], [], []>} : vector<2x32xf32>, vector<32x128xf32>, vector<2x128xf32> -> vector<2x128xf32>
    %122 = arith.addf %120, %121 : vector<2x128xf32>
    %123 = math.tanh %122 : vector<2x128xf32>
    %124 = vector.extract_strided_slice %123 {offsets = [0, 0], sizes = [2, 32], strides = [1, 1]} : vector<2x128xf32> to vector<2x32xf32>
    %cst_44 = arith.constant 1.000000e+00 : f32
    %125 = vector.broadcast %cst_44 : f32 to vector<2x32xf32>
    %126 = arith.addf %124, %125 : vector<2x32xf32>
    %cst_45 = arith.constant 5.000000e-01 : f32
    %127 = vector.broadcast %cst_45 : f32 to vector<2x32xf32>
    %128 = arith.mulf %127, %126 : vector<2x32xf32>
    %129 = vector.extract_strided_slice %123 {offsets = [0, 32], sizes = [2, 32], strides = [1, 1]} : vector<2x128xf32> to vector<2x32xf32>
    %cst_46 = arith.constant 1.000000e+00 : f32
    %130 = vector.broadcast %cst_46 : f32 to vector<2x32xf32>
    %131 = arith.addf %129, %130 : vector<2x32xf32>
    %cst_47 = arith.constant 5.000000e-01 : f32
    %132 = vector.broadcast %cst_47 : f32 to vector<2x32xf32>
    %133 = arith.mulf %132, %131 : vector<2x32xf32>
    %134 = vector.extract_strided_slice %123 {offsets = [0, 64], sizes = [2, 32], strides = [1, 1]} : vector<2x128xf32> to vector<2x32xf32>
    %135 = vector.extract_strided_slice %123 {offsets = [0, 96], sizes = [2, 32], strides = [1, 1]} : vector<2x128xf32> to vector<2x32xf32>
    %cst_48 = arith.constant 1.000000e+00 : f32
    %136 = vector.broadcast %cst_48 : f32 to vector<2x32xf32>
    %137 = arith.addf %135, %136 : vector<2x32xf32>
    %cst_49 = arith.constant 5.000000e-01 : f32
    %138 = vector.broadcast %cst_49 : f32 to vector<2x32xf32>
    %139 = arith.mulf %138, %137 : vector<2x32xf32>
    %140 = arith.mulf %133, %117 : vector<2x32xf32>
    %141 = arith.mulf %128, %134 : vector<2x32xf32>
    %142 = arith.addf %140, %141 : vector<2x32xf32>
    %143 = math.tanh %142 : vector<2x32xf32>
    %144 = arith.mulf %139, %143 : vector<2x32xf32>
    %145 = vector.extract_strided_slice %17 {offsets = [10, 0], sizes = [2, 128], strides = [1, 1]} : vector<16x128xf32> to vector<2x128xf32>
    %cst_50 = arith.constant dense<0.000000e+00> : vector<2x128xf32>
    %146 = tpu.matmul %144, %10, %cst_50 {dimension_numbers = #tpu.dot_dimension_numbers<[1], [0], [0], [1], [0, 0, 1, 1], [], []>} : vector<2x32xf32>, vector<32x128xf32>, vector<2x128xf32> -> vector<2x128xf32>
    %147 = arith.addf %145, %146 : vector<2x128xf32>
    %148 = math.tanh %147 : vector<2x128xf32>
    %149 = vector.extract_strided_slice %148 {offsets = [0, 0], sizes = [2, 32], strides = [1, 1]} : vector<2x128xf32> to vector<2x32xf32>
    %cst_51 = arith.constant 1.000000e+00 : f32
    %150 = vector.broadcast %cst_51 : f32 to vector<2x32xf32>
    %151 = arith.addf %149, %150 : vector<2x32xf32>
    %cst_52 = arith.constant 5.000000e-01 : f32
    %152 = vector.broadcast %cst_52 : f32 to vector<2x32xf32>
    %153 = arith.mulf %152, %151 : vector<2x32xf32>
    %154 = vector.extract_strided_slice %148 {offsets = [0, 32], sizes = [2, 32], strides = [1, 1]} : vector<2x128xf32> to vector<2x32xf32>
    %cst_53 = arith.constant 1.000000e+00 : f32
    %155 = vector.broadcast %cst_53 : f32 to vector<2x32xf32>
    %156 = arith.addf %154, %155 : vector<2x32xf32>
    %cst_54 = arith.constant 5.000000e-01 : f32
    %157 = vector.broadcast %cst_54 : f32 to vector<2x32xf32>
    %158 = arith.mulf %157, %156 : vector<2x32xf32>
    %159 = vector.extract_strided_slice %148 {offsets = [0, 64], sizes = [2, 32], strides = [1, 1]} : vector<2x128xf32> to vector<2x32xf32>
    %160 = vector.extract_strided_slice %148 {offsets = [0, 96], sizes = [2, 32], strides = [1, 1]} : vector<2x128xf32> to vector<2x32xf32>
    %cst_55 = arith.constant 1.000000e+00 : f32
    %161 = vector.broadcast %cst_55 : f32 to vector<2x32xf32>
    %162 = arith.addf %160, %161 : vector<2x32xf32>
    %cst_56 = arith.constant 5.000000e-01 : f32
    %163 = vector.broadcast %cst_56 : f32 to vector<2x32xf32>
    %164 = arith.mulf %163, %162 : vector<2x32xf32>
    %165 = arith.mulf %158, %142 : vector<2x32xf32>
    %166 = arith.mulf %153, %159 : vector<2x32xf32>
    %167 = arith.addf %165, %166 : vector<2x32xf32>
    %168 = math.tanh %167 : vector<2x32xf32>
    %169 = arith.mulf %164, %168 : vector<2x32xf32>
    %170 = vector.extract_strided_slice %17 {offsets = [12, 0], sizes = [2, 128], strides = [1, 1]} : vector<16x128xf32> to vector<2x128xf32>
    %cst_57 = arith.constant dense<0.000000e+00> : vector<2x128xf32>
    %171 = tpu.matmul %169, %10, %cst_57 {dimension_numbers = #tpu.dot_dimension_numbers<[1], [0], [0], [1], [0, 0, 1, 1], [], []>} : vector<2x32xf32>, vector<32x128xf32>, vector<2x128xf32> -> vector<2x128xf32>
    %172 = arith.addf %170, %171 : vector<2x128xf32>
    %173 = math.tanh %172 : vector<2x128xf32>
    %174 = vector.extract_strided_slice %173 {offsets = [0, 0], sizes = [2, 32], strides = [1, 1]} : vector<2x128xf32> to vector<2x32xf32>
    %cst_58 = arith.constant 1.000000e+00 : f32
    %175 = vector.broadcast %cst_58 : f32 to vector<2x32xf32>
    %176 = arith.addf %174, %175 : vector<2x32xf32>
    %cst_59 = arith.constant 5.000000e-01 : f32
    %177 = vector.broadcast %cst_59 : f32 to vector<2x32xf32>
    %178 = arith.mulf %177, %176 : vector<2x32xf32>
    %179 = vector.extract_strided_slice %173 {offsets = [0, 32], sizes = [2, 32], strides = [1, 1]} : vector<2x128xf32> to vector<2x32xf32>
    %cst_60 = arith.constant 1.000000e+00 : f32
    %180 = vector.broadcast %cst_60 : f32 to vector<2x32xf32>
    %181 = arith.addf %179, %180 : vector<2x32xf32>
    %cst_61 = arith.constant 5.000000e-01 : f32
    %182 = vector.broadcast %cst_61 : f32 to vector<2x32xf32>
    %183 = arith.mulf %182, %181 : vector<2x32xf32>
    %184 = vector.extract_strided_slice %173 {offsets = [0, 64], sizes = [2, 32], strides = [1, 1]} : vector<2x128xf32> to vector<2x32xf32>
    %185 = vector.extract_strided_slice %173 {offsets = [0, 96], sizes = [2, 32], strides = [1, 1]} : vector<2x128xf32> to vector<2x32xf32>
    %cst_62 = arith.constant 1.000000e+00 : f32
    %186 = vector.broadcast %cst_62 : f32 to vector<2x32xf32>
    %187 = arith.addf %185, %186 : vector<2x32xf32>
    %cst_63 = arith.constant 5.000000e-01 : f32
    %188 = vector.broadcast %cst_63 : f32 to vector<2x32xf32>
    %189 = arith.mulf %188, %187 : vector<2x32xf32>
    %190 = arith.mulf %183, %167 : vector<2x32xf32>
    %191 = arith.mulf %178, %184 : vector<2x32xf32>
    %192 = arith.addf %190, %191 : vector<2x32xf32>
    %193 = math.tanh %192 : vector<2x32xf32>
    %194 = arith.mulf %189, %193 : vector<2x32xf32>
    %195 = vector.extract_strided_slice %17 {offsets = [14, 0], sizes = [2, 128], strides = [1, 1]} : vector<16x128xf32> to vector<2x128xf32>
    %cst_64 = arith.constant dense<0.000000e+00> : vector<2x128xf32>
    %196 = tpu.matmul %194, %10, %cst_64 {dimension_numbers = #tpu.dot_dimension_numbers<[1], [0], [0], [1], [0, 0, 1, 1], [], []>} : vector<2x32xf32>, vector<32x128xf32>, vector<2x128xf32> -> vector<2x128xf32>
    %197 = arith.addf %195, %196 : vector<2x128xf32>
    %198 = math.tanh %197 : vector<2x128xf32>
    %199 = vector.extract_strided_slice %198 {offsets = [0, 0], sizes = [2, 32], strides = [1, 1]} : vector<2x128xf32> to vector<2x32xf32>
    %cst_65 = arith.constant 1.000000e+00 : f32
    %200 = vector.broadcast %cst_65 : f32 to vector<2x32xf32>
    %201 = arith.addf %199, %200 : vector<2x32xf32>
    %cst_66 = arith.constant 5.000000e-01 : f32
    %202 = vector.broadcast %cst_66 : f32 to vector<2x32xf32>
    %203 = arith.mulf %202, %201 : vector<2x32xf32>
    %204 = vector.extract_strided_slice %198 {offsets = [0, 32], sizes = [2, 32], strides = [1, 1]} : vector<2x128xf32> to vector<2x32xf32>
    %cst_67 = arith.constant 1.000000e+00 : f32
    %205 = vector.broadcast %cst_67 : f32 to vector<2x32xf32>
    %206 = arith.addf %204, %205 : vector<2x32xf32>
    %cst_68 = arith.constant 5.000000e-01 : f32
    %207 = vector.broadcast %cst_68 : f32 to vector<2x32xf32>
    %208 = arith.mulf %207, %206 : vector<2x32xf32>
    %209 = vector.extract_strided_slice %198 {offsets = [0, 64], sizes = [2, 32], strides = [1, 1]} : vector<2x128xf32> to vector<2x32xf32>
    %210 = vector.extract_strided_slice %198 {offsets = [0, 96], sizes = [2, 32], strides = [1, 1]} : vector<2x128xf32> to vector<2x32xf32>
    %cst_69 = arith.constant 1.000000e+00 : f32
    %211 = vector.broadcast %cst_69 : f32 to vector<2x32xf32>
    %212 = arith.addf %210, %211 : vector<2x32xf32>
    %cst_70 = arith.constant 5.000000e-01 : f32
    %213 = vector.broadcast %cst_70 : f32 to vector<2x32xf32>
    %214 = arith.mulf %213, %212 : vector<2x32xf32>
    %215 = arith.mulf %208, %192 : vector<2x32xf32>
    %216 = arith.mulf %203, %209 : vector<2x32xf32>
    %217 = arith.addf %215, %216 : vector<2x32xf32>
    %218 = math.tanh %217 : vector<2x32xf32>
    %219 = arith.mulf %214, %218 : vector<2x32xf32>
    %220 = tpu.concatenate %44, %69, %94, %119, %144, %169, %194, %219 in 0 : vector<2x32xf32>, vector<2x32xf32>, vector<2x32xf32>, vector<2x32xf32>, vector<2x32xf32>, vector<2x32xf32>, vector<2x32xf32>, vector<2x32xf32> -> vector<16x32xf32>
    %c1 = arith.constant 1 : index
    %c0_71 = arith.constant 0 : index
    %c0_72 = arith.constant 0 : index
    %221 = vector.load %arg2[%c1, %c0_71, %c0_72] : memref<2x32x128xf32, #tpu.memory_space<vmem>>, vector<1x32x128xf32>
    %222 = vector.shape_cast %221 : vector<1x32x128xf32> to vector<32x128xf32>
    %c1_73 = arith.constant 1 : index
    %c0_74 = arith.constant 0 : index
    %c0_75 = arith.constant 0 : index
    %223 = vector.load %arg3[%c1_73, %c0_74, %c0_75] : memref<2x32x128xf32, #tpu.memory_space<vmem>>, vector<1x32x128xf32>
    %224 = vector.shape_cast %223 : vector<1x32x128xf32> to vector<32x128xf32>
    %225 = vector.broadcast %4 : vector<1x128xf32> to vector<32x128xf32>
    %226 = arith.mulf %224, %225 : vector<32x128xf32>
    %c1_76 = arith.constant 1 : index
    %c0_77 = arith.constant 0 : index
    %c0_78 = arith.constant 0 : index
    %227 = vector.load %arg4[%c1_76, %c0_77, %c0_78] : memref<2x1x128xf32, #tpu.memory_space<vmem>>, vector<1x1x128xf32>
    %228 = vector.shape_cast %227 : vector<1x1x128xf32> to vector<1x128xf32>
    %cst_79 = arith.constant dense<0.000000e+00> : vector<16x128xf32>
    %229 = tpu.matmul %220, %222, %cst_79 {dimension_numbers = #tpu.dot_dimension_numbers<[1], [0], [0], [1], [0, 0, 1, 1], [], []>} : vector<16x32xf32>, vector<32x128xf32>, vector<16x128xf32> -> vector<16x128xf32>
    %230 = vector.broadcast %228 : vector<1x128xf32> to vector<16x128xf32>
    %231 = arith.addf %229, %230 : vector<16x128xf32>
    %232 = vector.broadcast %4 : vector<1x128xf32> to vector<16x128xf32>
    %233 = arith.mulf %231, %232 : vector<16x128xf32>
    %cst_80 = arith.constant 0.000000e+00 : f32
    %234 = vector.broadcast %cst_80 : f32 to vector<2x32xf32>
    %cst_81 = arith.constant 0.000000e+00 : f32
    %235 = vector.broadcast %cst_81 : f32 to vector<2x32xf32>
    %236 = vector.extract_strided_slice %233 {offsets = [0, 0], sizes = [2, 128], strides = [1, 1]} : vector<16x128xf32> to vector<2x128xf32>
    %cst_82 = arith.constant dense<0.000000e+00> : vector<2x128xf32>
    %237 = tpu.matmul %234, %226, %cst_82 {dimension_numbers = #tpu.dot_dimension_numbers<[1], [0], [0], [1], [0, 0, 1, 1], [], []>} : vector<2x32xf32>, vector<32x128xf32>, vector<2x128xf32> -> vector<2x128xf32>
    %238 = arith.addf %236, %237 : vector<2x128xf32>
    %239 = math.tanh %238 : vector<2x128xf32>
    %240 = vector.extract_strided_slice %239 {offsets = [0, 0], sizes = [2, 32], strides = [1, 1]} : vector<2x128xf32> to vector<2x32xf32>
    %cst_83 = arith.constant 1.000000e+00 : f32
    %241 = vector.broadcast %cst_83 : f32 to vector<2x32xf32>
    %242 = arith.addf %240, %241 : vector<2x32xf32>
    %cst_84 = arith.constant 5.000000e-01 : f32
    %243 = vector.broadcast %cst_84 : f32 to vector<2x32xf32>
    %244 = arith.mulf %243, %242 : vector<2x32xf32>
    %245 = vector.extract_strided_slice %239 {offsets = [0, 32], sizes = [2, 32], strides = [1, 1]} : vector<2x128xf32> to vector<2x32xf32>
    %cst_85 = arith.constant 1.000000e+00 : f32
    %246 = vector.broadcast %cst_85 : f32 to vector<2x32xf32>
    %247 = arith.addf %245, %246 : vector<2x32xf32>
    %cst_86 = arith.constant 5.000000e-01 : f32
    %248 = vector.broadcast %cst_86 : f32 to vector<2x32xf32>
    %249 = arith.mulf %248, %247 : vector<2x32xf32>
    %250 = vector.extract_strided_slice %239 {offsets = [0, 64], sizes = [2, 32], strides = [1, 1]} : vector<2x128xf32> to vector<2x32xf32>
    %251 = vector.extract_strided_slice %239 {offsets = [0, 96], sizes = [2, 32], strides = [1, 1]} : vector<2x128xf32> to vector<2x32xf32>
    %cst_87 = arith.constant 1.000000e+00 : f32
    %252 = vector.broadcast %cst_87 : f32 to vector<2x32xf32>
    %253 = arith.addf %251, %252 : vector<2x32xf32>
    %cst_88 = arith.constant 5.000000e-01 : f32
    %254 = vector.broadcast %cst_88 : f32 to vector<2x32xf32>
    %255 = arith.mulf %254, %253 : vector<2x32xf32>
    %256 = arith.mulf %249, %235 : vector<2x32xf32>
    %257 = arith.mulf %244, %250 : vector<2x32xf32>
    %258 = arith.addf %256, %257 : vector<2x32xf32>
    %259 = math.tanh %258 : vector<2x32xf32>
    %260 = arith.mulf %255, %259 : vector<2x32xf32>
    %261 = vector.extract_strided_slice %233 {offsets = [2, 0], sizes = [2, 128], strides = [1, 1]} : vector<16x128xf32> to vector<2x128xf32>
    %cst_89 = arith.constant dense<0.000000e+00> : vector<2x128xf32>
    %262 = tpu.matmul %260, %226, %cst_89 {dimension_numbers = #tpu.dot_dimension_numbers<[1], [0], [0], [1], [0, 0, 1, 1], [], []>} : vector<2x32xf32>, vector<32x128xf32>, vector<2x128xf32> -> vector<2x128xf32>
    %263 = arith.addf %261, %262 : vector<2x128xf32>
    %264 = math.tanh %263 : vector<2x128xf32>
    %265 = vector.extract_strided_slice %264 {offsets = [0, 0], sizes = [2, 32], strides = [1, 1]} : vector<2x128xf32> to vector<2x32xf32>
    %cst_90 = arith.constant 1.000000e+00 : f32
    %266 = vector.broadcast %cst_90 : f32 to vector<2x32xf32>
    %267 = arith.addf %265, %266 : vector<2x32xf32>
    %cst_91 = arith.constant 5.000000e-01 : f32
    %268 = vector.broadcast %cst_91 : f32 to vector<2x32xf32>
    %269 = arith.mulf %268, %267 : vector<2x32xf32>
    %270 = vector.extract_strided_slice %264 {offsets = [0, 32], sizes = [2, 32], strides = [1, 1]} : vector<2x128xf32> to vector<2x32xf32>
    %cst_92 = arith.constant 1.000000e+00 : f32
    %271 = vector.broadcast %cst_92 : f32 to vector<2x32xf32>
    %272 = arith.addf %270, %271 : vector<2x32xf32>
    %cst_93 = arith.constant 5.000000e-01 : f32
    %273 = vector.broadcast %cst_93 : f32 to vector<2x32xf32>
    %274 = arith.mulf %273, %272 : vector<2x32xf32>
    %275 = vector.extract_strided_slice %264 {offsets = [0, 64], sizes = [2, 32], strides = [1, 1]} : vector<2x128xf32> to vector<2x32xf32>
    %276 = vector.extract_strided_slice %264 {offsets = [0, 96], sizes = [2, 32], strides = [1, 1]} : vector<2x128xf32> to vector<2x32xf32>
    %cst_94 = arith.constant 1.000000e+00 : f32
    %277 = vector.broadcast %cst_94 : f32 to vector<2x32xf32>
    %278 = arith.addf %276, %277 : vector<2x32xf32>
    %cst_95 = arith.constant 5.000000e-01 : f32
    %279 = vector.broadcast %cst_95 : f32 to vector<2x32xf32>
    %280 = arith.mulf %279, %278 : vector<2x32xf32>
    %281 = arith.mulf %274, %258 : vector<2x32xf32>
    %282 = arith.mulf %269, %275 : vector<2x32xf32>
    %283 = arith.addf %281, %282 : vector<2x32xf32>
    %284 = math.tanh %283 : vector<2x32xf32>
    %285 = arith.mulf %280, %284 : vector<2x32xf32>
    %286 = vector.extract_strided_slice %233 {offsets = [4, 0], sizes = [2, 128], strides = [1, 1]} : vector<16x128xf32> to vector<2x128xf32>
    %cst_96 = arith.constant dense<0.000000e+00> : vector<2x128xf32>
    %287 = tpu.matmul %285, %226, %cst_96 {dimension_numbers = #tpu.dot_dimension_numbers<[1], [0], [0], [1], [0, 0, 1, 1], [], []>} : vector<2x32xf32>, vector<32x128xf32>, vector<2x128xf32> -> vector<2x128xf32>
    %288 = arith.addf %286, %287 : vector<2x128xf32>
    %289 = math.tanh %288 : vector<2x128xf32>
    %290 = vector.extract_strided_slice %289 {offsets = [0, 0], sizes = [2, 32], strides = [1, 1]} : vector<2x128xf32> to vector<2x32xf32>
    %cst_97 = arith.constant 1.000000e+00 : f32
    %291 = vector.broadcast %cst_97 : f32 to vector<2x32xf32>
    %292 = arith.addf %290, %291 : vector<2x32xf32>
    %cst_98 = arith.constant 5.000000e-01 : f32
    %293 = vector.broadcast %cst_98 : f32 to vector<2x32xf32>
    %294 = arith.mulf %293, %292 : vector<2x32xf32>
    %295 = vector.extract_strided_slice %289 {offsets = [0, 32], sizes = [2, 32], strides = [1, 1]} : vector<2x128xf32> to vector<2x32xf32>
    %cst_99 = arith.constant 1.000000e+00 : f32
    %296 = vector.broadcast %cst_99 : f32 to vector<2x32xf32>
    %297 = arith.addf %295, %296 : vector<2x32xf32>
    %cst_100 = arith.constant 5.000000e-01 : f32
    %298 = vector.broadcast %cst_100 : f32 to vector<2x32xf32>
    %299 = arith.mulf %298, %297 : vector<2x32xf32>
    %300 = vector.extract_strided_slice %289 {offsets = [0, 64], sizes = [2, 32], strides = [1, 1]} : vector<2x128xf32> to vector<2x32xf32>
    %301 = vector.extract_strided_slice %289 {offsets = [0, 96], sizes = [2, 32], strides = [1, 1]} : vector<2x128xf32> to vector<2x32xf32>
    %cst_101 = arith.constant 1.000000e+00 : f32
    %302 = vector.broadcast %cst_101 : f32 to vector<2x32xf32>
    %303 = arith.addf %301, %302 : vector<2x32xf32>
    %cst_102 = arith.constant 5.000000e-01 : f32
    %304 = vector.broadcast %cst_102 : f32 to vector<2x32xf32>
    %305 = arith.mulf %304, %303 : vector<2x32xf32>
    %306 = arith.mulf %299, %283 : vector<2x32xf32>
    %307 = arith.mulf %294, %300 : vector<2x32xf32>
    %308 = arith.addf %306, %307 : vector<2x32xf32>
    %309 = math.tanh %308 : vector<2x32xf32>
    %310 = arith.mulf %305, %309 : vector<2x32xf32>
    %311 = vector.extract_strided_slice %233 {offsets = [6, 0], sizes = [2, 128], strides = [1, 1]} : vector<16x128xf32> to vector<2x128xf32>
    %cst_103 = arith.constant dense<0.000000e+00> : vector<2x128xf32>
    %312 = tpu.matmul %310, %226, %cst_103 {dimension_numbers = #tpu.dot_dimension_numbers<[1], [0], [0], [1], [0, 0, 1, 1], [], []>} : vector<2x32xf32>, vector<32x128xf32>, vector<2x128xf32> -> vector<2x128xf32>
    %313 = arith.addf %311, %312 : vector<2x128xf32>
    %314 = math.tanh %313 : vector<2x128xf32>
    %315 = vector.extract_strided_slice %314 {offsets = [0, 0], sizes = [2, 32], strides = [1, 1]} : vector<2x128xf32> to vector<2x32xf32>
    %cst_104 = arith.constant 1.000000e+00 : f32
    %316 = vector.broadcast %cst_104 : f32 to vector<2x32xf32>
    %317 = arith.addf %315, %316 : vector<2x32xf32>
    %cst_105 = arith.constant 5.000000e-01 : f32
    %318 = vector.broadcast %cst_105 : f32 to vector<2x32xf32>
    %319 = arith.mulf %318, %317 : vector<2x32xf32>
    %320 = vector.extract_strided_slice %314 {offsets = [0, 32], sizes = [2, 32], strides = [1, 1]} : vector<2x128xf32> to vector<2x32xf32>
    %cst_106 = arith.constant 1.000000e+00 : f32
    %321 = vector.broadcast %cst_106 : f32 to vector<2x32xf32>
    %322 = arith.addf %320, %321 : vector<2x32xf32>
    %cst_107 = arith.constant 5.000000e-01 : f32
    %323 = vector.broadcast %cst_107 : f32 to vector<2x32xf32>
    %324 = arith.mulf %323, %322 : vector<2x32xf32>
    %325 = vector.extract_strided_slice %314 {offsets = [0, 64], sizes = [2, 32], strides = [1, 1]} : vector<2x128xf32> to vector<2x32xf32>
    %326 = vector.extract_strided_slice %314 {offsets = [0, 96], sizes = [2, 32], strides = [1, 1]} : vector<2x128xf32> to vector<2x32xf32>
    %cst_108 = arith.constant 1.000000e+00 : f32
    %327 = vector.broadcast %cst_108 : f32 to vector<2x32xf32>
    %328 = arith.addf %326, %327 : vector<2x32xf32>
    %cst_109 = arith.constant 5.000000e-01 : f32
    %329 = vector.broadcast %cst_109 : f32 to vector<2x32xf32>
    %330 = arith.mulf %329, %328 : vector<2x32xf32>
    %331 = arith.mulf %324, %308 : vector<2x32xf32>
    %332 = arith.mulf %319, %325 : vector<2x32xf32>
    %333 = arith.addf %331, %332 : vector<2x32xf32>
    %334 = math.tanh %333 : vector<2x32xf32>
    %335 = arith.mulf %330, %334 : vector<2x32xf32>
    %336 = vector.extract_strided_slice %233 {offsets = [8, 0], sizes = [2, 128], strides = [1, 1]} : vector<16x128xf32> to vector<2x128xf32>
    %cst_110 = arith.constant dense<0.000000e+00> : vector<2x128xf32>
    %337 = tpu.matmul %335, %226, %cst_110 {dimension_numbers = #tpu.dot_dimension_numbers<[1], [0], [0], [1], [0, 0, 1, 1], [], []>} : vector<2x32xf32>, vector<32x128xf32>, vector<2x128xf32> -> vector<2x128xf32>
    %338 = arith.addf %336, %337 : vector<2x128xf32>
    %339 = math.tanh %338 : vector<2x128xf32>
    %340 = vector.extract_strided_slice %339 {offsets = [0, 0], sizes = [2, 32], strides = [1, 1]} : vector<2x128xf32> to vector<2x32xf32>
    %cst_111 = arith.constant 1.000000e+00 : f32
    %341 = vector.broadcast %cst_111 : f32 to vector<2x32xf32>
    %342 = arith.addf %340, %341 : vector<2x32xf32>
    %cst_112 = arith.constant 5.000000e-01 : f32
    %343 = vector.broadcast %cst_112 : f32 to vector<2x32xf32>
    %344 = arith.mulf %343, %342 : vector<2x32xf32>
    %345 = vector.extract_strided_slice %339 {offsets = [0, 32], sizes = [2, 32], strides = [1, 1]} : vector<2x128xf32> to vector<2x32xf32>
    %cst_113 = arith.constant 1.000000e+00 : f32
    %346 = vector.broadcast %cst_113 : f32 to vector<2x32xf32>
    %347 = arith.addf %345, %346 : vector<2x32xf32>
    %cst_114 = arith.constant 5.000000e-01 : f32
    %348 = vector.broadcast %cst_114 : f32 to vector<2x32xf32>
    %349 = arith.mulf %348, %347 : vector<2x32xf32>
    %350 = vector.extract_strided_slice %339 {offsets = [0, 64], sizes = [2, 32], strides = [1, 1]} : vector<2x128xf32> to vector<2x32xf32>
    %351 = vector.extract_strided_slice %339 {offsets = [0, 96], sizes = [2, 32], strides = [1, 1]} : vector<2x128xf32> to vector<2x32xf32>
    %cst_115 = arith.constant 1.000000e+00 : f32
    %352 = vector.broadcast %cst_115 : f32 to vector<2x32xf32>
    %353 = arith.addf %351, %352 : vector<2x32xf32>
    %cst_116 = arith.constant 5.000000e-01 : f32
    %354 = vector.broadcast %cst_116 : f32 to vector<2x32xf32>
    %355 = arith.mulf %354, %353 : vector<2x32xf32>
    %356 = arith.mulf %349, %333 : vector<2x32xf32>
    %357 = arith.mulf %344, %350 : vector<2x32xf32>
    %358 = arith.addf %356, %357 : vector<2x32xf32>
    %359 = math.tanh %358 : vector<2x32xf32>
    %360 = arith.mulf %355, %359 : vector<2x32xf32>
    %361 = vector.extract_strided_slice %233 {offsets = [10, 0], sizes = [2, 128], strides = [1, 1]} : vector<16x128xf32> to vector<2x128xf32>
    %cst_117 = arith.constant dense<0.000000e+00> : vector<2x128xf32>
    %362 = tpu.matmul %360, %226, %cst_117 {dimension_numbers = #tpu.dot_dimension_numbers<[1], [0], [0], [1], [0, 0, 1, 1], [], []>} : vector<2x32xf32>, vector<32x128xf32>, vector<2x128xf32> -> vector<2x128xf32>
    %363 = arith.addf %361, %362 : vector<2x128xf32>
    %364 = math.tanh %363 : vector<2x128xf32>
    %365 = vector.extract_strided_slice %364 {offsets = [0, 0], sizes = [2, 32], strides = [1, 1]} : vector<2x128xf32> to vector<2x32xf32>
    %cst_118 = arith.constant 1.000000e+00 : f32
    %366 = vector.broadcast %cst_118 : f32 to vector<2x32xf32>
    %367 = arith.addf %365, %366 : vector<2x32xf32>
    %cst_119 = arith.constant 5.000000e-01 : f32
    %368 = vector.broadcast %cst_119 : f32 to vector<2x32xf32>
    %369 = arith.mulf %368, %367 : vector<2x32xf32>
    %370 = vector.extract_strided_slice %364 {offsets = [0, 32], sizes = [2, 32], strides = [1, 1]} : vector<2x128xf32> to vector<2x32xf32>
    %cst_120 = arith.constant 1.000000e+00 : f32
    %371 = vector.broadcast %cst_120 : f32 to vector<2x32xf32>
    %372 = arith.addf %370, %371 : vector<2x32xf32>
    %cst_121 = arith.constant 5.000000e-01 : f32
    %373 = vector.broadcast %cst_121 : f32 to vector<2x32xf32>
    %374 = arith.mulf %373, %372 : vector<2x32xf32>
    %375 = vector.extract_strided_slice %364 {offsets = [0, 64], sizes = [2, 32], strides = [1, 1]} : vector<2x128xf32> to vector<2x32xf32>
    %376 = vector.extract_strided_slice %364 {offsets = [0, 96], sizes = [2, 32], strides = [1, 1]} : vector<2x128xf32> to vector<2x32xf32>
    %cst_122 = arith.constant 1.000000e+00 : f32
    %377 = vector.broadcast %cst_122 : f32 to vector<2x32xf32>
    %378 = arith.addf %376, %377 : vector<2x32xf32>
    %cst_123 = arith.constant 5.000000e-01 : f32
    %379 = vector.broadcast %cst_123 : f32 to vector<2x32xf32>
    %380 = arith.mulf %379, %378 : vector<2x32xf32>
    %381 = arith.mulf %374, %358 : vector<2x32xf32>
    %382 = arith.mulf %369, %375 : vector<2x32xf32>
    %383 = arith.addf %381, %382 : vector<2x32xf32>
    %384 = math.tanh %383 : vector<2x32xf32>
    %385 = arith.mulf %380, %384 : vector<2x32xf32>
    %386 = vector.extract_strided_slice %233 {offsets = [12, 0], sizes = [2, 128], strides = [1, 1]} : vector<16x128xf32> to vector<2x128xf32>
    %cst_124 = arith.constant dense<0.000000e+00> : vector<2x128xf32>
    %387 = tpu.matmul %385, %226, %cst_124 {dimension_numbers = #tpu.dot_dimension_numbers<[1], [0], [0], [1], [0, 0, 1, 1], [], []>} : vector<2x32xf32>, vector<32x128xf32>, vector<2x128xf32> -> vector<2x128xf32>
    %388 = arith.addf %386, %387 : vector<2x128xf32>
    %389 = math.tanh %388 : vector<2x128xf32>
    %390 = vector.extract_strided_slice %389 {offsets = [0, 0], sizes = [2, 32], strides = [1, 1]} : vector<2x128xf32> to vector<2x32xf32>
    %cst_125 = arith.constant 1.000000e+00 : f32
    %391 = vector.broadcast %cst_125 : f32 to vector<2x32xf32>
    %392 = arith.addf %390, %391 : vector<2x32xf32>
    %cst_126 = arith.constant 5.000000e-01 : f32
    %393 = vector.broadcast %cst_126 : f32 to vector<2x32xf32>
    %394 = arith.mulf %393, %392 : vector<2x32xf32>
    %395 = vector.extract_strided_slice %389 {offsets = [0, 32], sizes = [2, 32], strides = [1, 1]} : vector<2x128xf32> to vector<2x32xf32>
    %cst_127 = arith.constant 1.000000e+00 : f32
    %396 = vector.broadcast %cst_127 : f32 to vector<2x32xf32>
    %397 = arith.addf %395, %396 : vector<2x32xf32>
    %cst_128 = arith.constant 5.000000e-01 : f32
    %398 = vector.broadcast %cst_128 : f32 to vector<2x32xf32>
    %399 = arith.mulf %398, %397 : vector<2x32xf32>
    %400 = vector.extract_strided_slice %389 {offsets = [0, 64], sizes = [2, 32], strides = [1, 1]} : vector<2x128xf32> to vector<2x32xf32>
    %401 = vector.extract_strided_slice %389 {offsets = [0, 96], sizes = [2, 32], strides = [1, 1]} : vector<2x128xf32> to vector<2x32xf32>
    %cst_129 = arith.constant 1.000000e+00 : f32
    %402 = vector.broadcast %cst_129 : f32 to vector<2x32xf32>
    %403 = arith.addf %401, %402 : vector<2x32xf32>
    %cst_130 = arith.constant 5.000000e-01 : f32
    %404 = vector.broadcast %cst_130 : f32 to vector<2x32xf32>
    %405 = arith.mulf %404, %403 : vector<2x32xf32>
    %406 = arith.mulf %399, %383 : vector<2x32xf32>
    %407 = arith.mulf %394, %400 : vector<2x32xf32>
    %408 = arith.addf %406, %407 : vector<2x32xf32>
    %409 = math.tanh %408 : vector<2x32xf32>
    %410 = arith.mulf %405, %409 : vector<2x32xf32>
    %411 = vector.extract_strided_slice %233 {offsets = [14, 0], sizes = [2, 128], strides = [1, 1]} : vector<16x128xf32> to vector<2x128xf32>
    %cst_131 = arith.constant dense<0.000000e+00> : vector<2x128xf32>
    %412 = tpu.matmul %410, %226, %cst_131 {dimension_numbers = #tpu.dot_dimension_numbers<[1], [0], [0], [1], [0, 0, 1, 1], [], []>} : vector<2x32xf32>, vector<32x128xf32>, vector<2x128xf32> -> vector<2x128xf32>
    %413 = arith.addf %411, %412 : vector<2x128xf32>
    %414 = math.tanh %413 : vector<2x128xf32>
    %415 = vector.extract_strided_slice %414 {offsets = [0, 0], sizes = [2, 32], strides = [1, 1]} : vector<2x128xf32> to vector<2x32xf32>
    %cst_132 = arith.constant 1.000000e+00 : f32
    %416 = vector.broadcast %cst_132 : f32 to vector<2x32xf32>
    %417 = arith.addf %415, %416 : vector<2x32xf32>
    %cst_133 = arith.constant 5.000000e-01 : f32
    %418 = vector.broadcast %cst_133 : f32 to vector<2x32xf32>
    %419 = arith.mulf %418, %417 : vector<2x32xf32>
    %420 = vector.extract_strided_slice %414 {offsets = [0, 32], sizes = [2, 32], strides = [1, 1]} : vector<2x128xf32> to vector<2x32xf32>
    %cst_134 = arith.constant 1.000000e+00 : f32
    %421 = vector.broadcast %cst_134 : f32 to vector<2x32xf32>
    %422 = arith.addf %420, %421 : vector<2x32xf32>
    %cst_135 = arith.constant 5.000000e-01 : f32
    %423 = vector.broadcast %cst_135 : f32 to vector<2x32xf32>
    %424 = arith.mulf %423, %422 : vector<2x32xf32>
    %425 = vector.extract_strided_slice %414 {offsets = [0, 64], sizes = [2, 32], strides = [1, 1]} : vector<2x128xf32> to vector<2x32xf32>
    %426 = vector.extract_strided_slice %414 {offsets = [0, 96], sizes = [2, 32], strides = [1, 1]} : vector<2x128xf32> to vector<2x32xf32>
    %cst_136 = arith.constant 1.000000e+00 : f32
    %427 = vector.broadcast %cst_136 : f32 to vector<2x32xf32>
    %428 = arith.addf %426, %427 : vector<2x32xf32>
    %cst_137 = arith.constant 5.000000e-01 : f32
    %429 = vector.broadcast %cst_137 : f32 to vector<2x32xf32>
    %430 = arith.mulf %429, %428 : vector<2x32xf32>
    %431 = arith.mulf %424, %408 : vector<2x32xf32>
    %432 = arith.mulf %419, %425 : vector<2x32xf32>
    %433 = arith.addf %431, %432 : vector<2x32xf32>
    %434 = math.tanh %433 : vector<2x32xf32>
    %435 = arith.mulf %430, %434 : vector<2x32xf32>
    %436 = tpu.concatenate %260, %285, %310, %335, %360, %385, %410, %435 in 0 : vector<2x32xf32>, vector<2x32xf32>, vector<2x32xf32>, vector<2x32xf32>, vector<2x32xf32>, vector<2x32xf32>, vector<2x32xf32>, vector<2x32xf32> -> vector<16x32xf32>
    %c0_138 = arith.constant 0 : index
    %c0_139 = arith.constant 0 : index
    %437 = vector.load %arg5[%c0_138, %c0_139] : memref<16x32xf32, #tpu.memory_space<vmem>>, vector<16x32xf32>
    tpu.vector_store %arg5[%c0_138, %c0_139], %436 {strides = array<i32>} : memref<16x32xf32, #tpu.memory_space<vmem>>, vector<16x32xf32>,
    return
  }
  func.func @transform_0(%arg0: i32) -> (i32, i32) {
    %c0_i32 = arith.constant 0 : i32
    %c0_i32_0 = arith.constant 0 : i32
    %c0_i32_1 = arith.constant 0 : i32
    return %c0_i32, %c0_i32_0 : i32, i32
  }
  func.func @transform_1(%arg0: i32) -> (i32, i32, i32) {
    %c0_i32 = arith.constant 0 : i32
    %c0_i32_0 = arith.constant 0 : i32
    %c0_i32_1 = arith.constant 0 : i32
    %c0_i32_2 = arith.constant 0 : i32
    return %c0_i32, %c0_i32_0, %c0_i32_1 : i32, i32, i32
  }
  func.func @transform_2(%arg0: i32) -> (i32, i32, i32) {
    %c0_i32 = arith.constant 0 : i32
    %c0_i32_0 = arith.constant 0 : i32
    %c0_i32_1 = arith.constant 0 : i32
    %c0_i32_2 = arith.constant 0 : i32
    return %c0_i32, %c0_i32_0, %c0_i32_1 : i32, i32, i32
  }
  func.func @transform_3(%arg0: i32) -> (i32, i32, i32) {
    %c0_i32 = arith.constant 0 : i32
    %c0_i32_0 = arith.constant 0 : i32
    %c0_i32_1 = arith.constant 0 : i32
    %c0_i32_2 = arith.constant 0 : i32
    return %c0_i32, %c0_i32_0, %c0_i32_1 : i32, i32, i32
  }
  func.func @transform_4(%arg0: i32) -> (i32, i32) {
    %c0_i32 = arith.constant 0 : i32
    %c0_i32_0 = arith.constant 0 : i32
    %c0_i32_1 = arith.constant 0 : i32
    return %c0_i32, %c0_i32_0 : i32, i32
  }
}

</mosaic_0001>

<bundles_post_ra>
// kernel: residual_adapter_forward.1
= control target key start
LH: loop header
LB: loop body
LE: loop exit
PB: predicated region body
PF: predicated region fallthrough
CT: control target
= control target key end

     0   :  { %9 = vsyncpa [#allocation3], 0  ;;  %s2738_s0 = inlined_call_operand.vmem [shape: f32[16,32], index: 0, kind: input, shape index: {}]   ;;  %s2739_s1 = inlined_call_operand.hbm [shape: f32[2,32,128], index: 1, kind: input, shape index: {}]   ;;  %s2740_s2 = inlined_call_operand.hbm [shape: f32[2,32,128], index: 2, kind: input, shape index: {}]   ;;  %s2741_s3 = inlined_call_operand.vmem [shape: f32[2,1,128], index: 3, kind: input, shape index: {}]   ;;  %s2742_s4 = inlined_call_operand.vmem [shape: f32[16,32], index: 4, kind: output, shape index: {}]  }
   0x1   :  { %10 = vsyncpa [#allocation5], 0  ;;  %s2343_s15 = smov [#allocation2]  }
   0x2   :  { %s18_s16 = sshll.u32 %s2343_s15, 4  ;;  %s19_s16 = int_to_ptr.vmem [resolvable:$true] %s18_s16 }
   0x3   :  { %s2307_s17 = scalar_lea.vmem %s19_s16, 1024  ;;  %p2312_p1 = scmp.lt.s32.totalorder %s19_s16, %s19_s16 }
   0x4   :  { %p2308_p0 = scmp.ne.s32.totalorder %s19_s16, %s2307_s17  ;;  %p2313_p2 = scmp.lt.s32.totalorder %s2307_s17, %s2307_s17 }
   0x6   :  { %p2314_p3 = por %p2313_p2, %p2312_p1 }
   0x8   :  { %p2315_p4 = pnand %p2314_p3, %p2308_p0 }
   0xa   :  { %2318 = shalt.err (!%p2315_p4)
}
   0xb   :  { %s2344_s18 = smov 128   ;;  %s2345_s19 = smov 8  }
   0xc   :  { %24 = dma.hbm_to_vmem [thread:$0]  %s2739_s1, 1024, %s19_s16, [#allocation3], %s2344_s18, %s2344_s18, %s2345_s19  }
   0xd   :  { %s2346_s22 = smov [#allocation4]  }
   0xe   :  { %s30_s23 = sshll.u32 %s2346_s22, 4  ;;  %s31_s23 = int_to_ptr.vmem [resolvable:$true] %s30_s23 }
   0xf   :  { %s2327_s24 = scalar_lea.vmem %s31_s23, 1024  ;;  %p2332_p6 = scmp.lt.s32.totalorder %s31_s23, %s31_s23 }
  0x10   :  { %p2328_p5 = scmp.ne.s32.totalorder %s31_s23, %s2327_s24  ;;  %p2333_p7 = scmp.lt.s32.totalorder %s2327_s24, %s2327_s24 }
  0x12   :  { %p2334_p8 = por %p2333_p7, %p2332_p6 }
  0x14   :  { %p2335_p9 = pnand %p2334_p8, %p2328_p5 }
  0x16   :  { %2338 = shalt.err (!%p2335_p9)
}
  0x17   :  { %36 = dma.hbm_to_vmem [thread:$0]  %s2740_s2, 1024, %s31_s23, [#allocation5], %s2344_s18, %s2344_s18, %s2345_s19  }
  0x18   :  { %2339 = dma.done.wait [#allocation3], 1024  }
  0x19   :  { %2340 = vsyncadd [#allocation3], 4294966272 }
  0x1a   :  { %2341 = dma.done.wait [#allocation5], 1024  }
  0x1b   :  { %2342 = vsyncadd [#allocation5], 4294966272  ;;  %vm47_vm0 = vcmask 523264   ;;  %v2347_v0 = vmov 0.0   ;;  %v2348_v1 = vmov 1.0   ;;  %vm49_vm1 = vcmask 785408  }
  0x1c   :  { %2039 = vmatprep.subr.mxu1 %v2347_v0  ;;  %v48_v2 = vsel %vm47_vm0, 0.5, %v2348_v1  ;;  %v59_v3 = vlaneseq  ;;  %vm2349_vm2 = vmmov 0   ;;  %vm74_vm3 = vcmask 261120   ;;  %v54_v7 = vld [vmem:[#allocation2 + $0x18] sm:$0xff]  ;;  %v53_v8 = vld [vmem:[#allocation2 + $0x10] sm:$0xff]  ;;  %v45_v11 = vld [vmem:[%s2738_s0] sm:$0xff] }
  0x1d   :  { %2047 = vmatprep.mubr.msk.f32.mxu1 %vm2349_vm2, %v2347_v0  ;;  %v50_v5 = vsel %vm49_vm1, %v48_v2, 0.5  ;;  %2028 = vmatprep.subr.mxu0 %v54_v7  ;;  %v58_v10 = vld [vmem:[#allocation4 + $0x18] sm:$0xff]  ;;  %v52_v12 = vld [vmem:[#allocation2 + $0x8] sm:$0xff]  ;;  %v57_v14 = vld [vmem:[#allocation4 + $0x10] sm:$0xff]  ;;  %s2350_s30 = smov 64   ;;  %s2351_s5 = smov 32  }
  0x1e   :  { %v60_v4 = vshrl.u32 %v59_v3, 7  ;;  %2029 = vmatpush3.msra.mxu0 %v54_v7  ;;  %2036 = vmatprep.mubr.msk.f32.mxu0 %vm74_vm3, %v45_v11  ;;  %v56_v15 = vld [vmem:[#allocation4 + $0x8] sm:$0xff]  ;;  %v55_v17 = vld [vmem:[#allocation4] sm:$0xff]  ;;  %vm968_vm4 = vcmask 1041408   ;;  %vm970_vm5 = vcmask 1043456   ;;  %vm972_vm6 = vcmask 1045504  }
  0x1f   :  { %2030 = vmatprep.subr.mxu0 %v53_v8  ;;  %v51_v18 = vld [vmem:[#allocation2] sm:$0xff]  ;;  %v46_v20 = vld [vmem:[%s2738_s0 + $0x8] sm:$0xff] }
  0x20   :  { %v61_v6 = vsub.s32 0, %v60_v4  ;;  %2031 = vmatpush3.msra.mxu0 %v53_v8  ;;  %v1915_v22 = vld [vmem:[%s2741_s3] ss:$0 sm:$0xff] }
  0x21   :  { %2032 = vmatprep.subr.mxu0 %v52_v12 }
  0x22   :  { %v2386_v9 = vrot.slane %v50_v5, %v61_v6  ;;  %2033 = vmatpush3.msra.mxu0 %v52_v12 }
  0x23   :  { %2034 = vmatprep.subr.mxu0 %v51_v18 }
  0x24   :  { %v2392_v13 = vmul.f32 %v2386_v9, %v58_v10  ;;  %v2396_v16 = vmul.f32 %v2386_v9, %v57_v14  ;;  %v2400_v19 = vmul.f32 %v2386_v9, %v56_v15  ;;  %v2408_v21 = vmul.f32 %v2386_v9, %v55_v17  ;;  %2035 = vmatpush3.msra.mxu0 %v51_v18 }
  0x25   :  { %2037 = vmatmul.mubr.msk.f32.vlgmr.msra.gmra.mxu0 %vm74_vm3, %v46_v20  ;;  %2050 = vmatprep.subr.mxu0 %v2347_v0 }
  0x26   :  { %2040 = vmatpush3.msra.mxu1 %v2392_v13  ;;  %2051 = vmatpush3.msra.mxu0 %v2392_v13 }
  0x27   :  { %2041 = vmatprep.subr.mxu1 %v2347_v0  ;;  %2052 = vmatprep.subr.mxu0 %v2347_v0 }
  0x28   :  { %2042 = vmatpush3.msra.mxu1 %v2396_v16  ;;  %2058 = vmatprep.mubr.msk.f32.mxu0 %vm2349_vm2, %v2347_v0 }
  0x29   :  { %2043 = vmatprep.subr.mxu1 %v2347_v0  ;;  %2053 = vmatpush3.msra.mxu0 %v2396_v16 }
  0x2a   :  { %2044 = vmatpush3.msra.mxu1 %v2400_v19  ;;  %2054 = vmatprep.subr.mxu0 %v2347_v0 }
  0x2b   :  { %2045 = vmatprep.subr.mxu1 %v2347_v0  ;;  %2055 = vmatpush3.msra.mxu0 %v2400_v19 }
  0x2c   :  { %2046 = vmatpush3.msra.mxu1 %v2408_v21  ;;  %2056 = vmatprep.subr.mxu0 %v2347_v0 }
  0x2d   :  { %2048 = vmatmul.mubr.f32.vlgmr.msra.gmra.mxu1 %v2347_v0  ;;  %2061 = vmatprep.subr.mxu1 %v2347_v0 }
  0x2e   :  { %2062 = vmatpush3.msra.mxu1 %v2392_v13  ;;  %2057 = vmatpush3.msra.mxu0 %v2408_v21 }
  0x2f   :  { %2063 = vmatprep.subr.mxu1 %v2347_v0  ;;  %2069 = vmatprep.mubr.msk.f32.mxu1 %vm2349_vm2, %v2347_v0 }
  0x30   :  { %2064 = vmatpush3.msra.mxu1 %v2396_v16  ;;  %2072 = vmatprep.subr.mxu0 %v2347_v0 }
  0x31   :  { %2065 = vmatprep.subr.mxu1 %v2347_v0 }
  0x32   :  { %2066 = vmatpush3.msra.mxu1 %v2400_v19 }
  0x33   :  { %2067 = vmatprep.subr.mxu1 %v2347_v0 }
  0x34   :  { %2068 = vmatpush3.msra.mxu1 %v2408_v21 }
  0x35   :  { %2083 = vmatprep.subr.mxu1 %v2347_v0 }
  0xe5   :  { %v2038_v23 = vpop.f32.mrf.mxu0 }
  0xe6   :  { %v2441_v24 = vadd.f32 %v2038_v23, %v1915_v22 }
  0xe7   :  { %v147_v25 = vpop.f32.mrf.mxu0 }
  0xe8   :  { %v148_v27 = vadd.f32 %v1915_v22, %v147_v25 }
  0xea   :  { %v2444_v29 = vmul.f32 %v148_v27, %v2386_v9 }
  0xed   :  { %v227_v26 = vpop.f32.mrf.mxu1 }
  0xee   :  { %v231_v30 = vadd.f32 %v227_v26, %v2444_v29 }
  0xef   :  { %v2049_v28 = vpop.f32.mrf.mxu1 }
  0xf0   :  { %2235 = vtanh.f32 %v231_v30 }
  0xfd   :  { %v2236_v31 = vpop.eup %2235 }
  0xfe   :  { %237 = vrot.lane.b32.xlu0 %v2236_v31, %s2350_s30  ;;  %v233_v32 = vadd.f32 1.0, %v2236_v31 }
 0x100   :  { %v234_v33 = vmul.f32 0.5, %v233_v32 }
 0x102   :  { %v235_v36 = vmul.f32 0.0, %v234_v33 }
 0x170   :  { %v238_v34 = vpop.permute.xlu0 %237 }
 0x171   :  { %v240_v35 = vmul.f32 %v238_v34, %v234_v33 }
 0x173   :  { %242 = vrot.lane.b32.xlu0 %v240_v35, %s2351_s5 }
 0x1e5   :  { %v243_v37 = vpop.permute.xlu0 %242 }
 0x1e6   :  { %v245_v38 = vadd.f32 %v243_v37, %v235_v36 }
 0x1e8   :  { %2237 = vtanh.f32 %v245_v38  ;;  %v335_v52 = vrot.slane %v245_v38, 6 }
 0x1f5   :  { %v2238_v39 = vpop.eup %2237 }
 0x1f6   :  { %248 = vrot.lane.b32.xlu1 %v2238_v39, %s2350_s30 }
 0x268   :  { %v249_v40 = vpop.permute.xlu1 %248 }
 0x269   :  { %v2450_v41 = vmul.f32 %v249_v40, %v234_v33 }
 0x26b   :  { %253 = vrot.lane.b32.xlu1 %v2450_v41, %s2351_s5 }
 0x2dd   :  { %v254_v42 = vpop.permute.xlu1 %253 }
 0x2de   :  { %2059 = vmatmul.mubr.msk.f32.vlgmr.msra.gmra.mxu0 %vm74_vm3, %v254_v42 }
 0x2df   :  { %2073 = vmatpush3.msra.mxu0 %v2392_v13  ;;  %2080 = vmatprep.mubr.msk.f32.mxu0 %vm2349_vm2, %v2347_v0 }
 0x2e0   :  { %2074 = vmatprep.subr.mxu0 %v2347_v0 }
 0x2e1   :  { %2075 = vmatpush3.msra.mxu0 %v2396_v16 }
 0x2e2   :  { %2076 = vmatprep.subr.mxu0 %v2347_v0 }
 0x2e3   :  { %2077 = vmatpush3.msra.mxu0 %v2400_v19 }
 0x2e4   :  { %2078 = vmatprep.subr.mxu0 %v2347_v0 }
 0x2e5   :  { %2079 = vmatpush3.msra.mxu0 %v2408_v21 }
 0x2e6   :  { %2094 = vmatprep.subr.mxu0 %v2347_v0 }
 0x39e   :  { %v323_v43 = vpop.f32.mrf.mxu0 }
 0x39f   :  { %v328_v44 = vrot.slane %v323_v43, 6  ;;  %v2520_v43 = vmul.f32 %v2441_v24, %v2386_v9 }
 0x3a0   :  { %v2060_v45 = vpop.f32.mrf.mxu0 }
 0x3a1   :  { %v330_v46 = vadd.f32 %v328_v44, %v2444_v29 }
 0x3a3   :  { %2239 = vtanh.f32 %v330_v46 }
 0x3b0   :  { %v2240_v47 = vpop.eup %2239 }
 0x3b1   :  { %339 = vrot.lane.b32.xlu0 %v2240_v47, %s2350_s30  ;;  %v332_v48 = vadd.f32 1.0, %v2240_v47 }
 0x3b3   :  { %v333_v49 = vmul.f32 0.5, %v332_v48 }
 0x3b5   :  { %v337_v53 = vmul.f32 %v335_v52, %v333_v49 }
 0x423   :  { %v340_v50 = vpop.permute.xlu0 %339 }
 0x424   :  { %v342_v51 = vmul.f32 %v340_v50, %v333_v49 }
 0x426   :  { %344 = vrot.lane.b32.xlu1 %v342_v51, %s2351_s5 }
 0x498   :  { %v345_v54 = vpop.permute.xlu1 %344 }
 0x499   :  { %v347_v55 = vadd.f32 %v345_v54, %v337_v53 }
 0x49b   :  { %2241 = vtanh.f32 %v347_v55  ;;  %v438_v7 = vrot.slane %v347_v55, 6 }
 0x4a8   :  { %v2242_v56 = vpop.eup %2241 }
 0x4a9   :  { %350 = vrot.lane.b32.xlu0 %v2242_v56, %s2350_s30 }
 0x51b   :  { %v351_v57 = vpop.permute.xlu0 %350 }
 0x51c   :  { %v353_v58 = vmul.f32 %v351_v57, %v333_v49 }
 0x51e   :  { %v355_v59 = vrot.slane %v353_v58, 2  ;;  %v969_v17 = vsel %vm968_vm4, %v2450_v41, %v353_v58 }
 0x520   :  { %356 = vrot.lane.b32.xlu1 %v355_v59, %s2351_s5 }
 0x592   :  { %v357_v60 = vpop.permute.xlu1 %356 }
 0x593   :  { %2070 = vmatmul.mubr.msk.f32.vlgmr.msra.gmra.mxu1 %vm74_vm3, %v357_v60 }
 0x594   :  { %2084 = vmatpush3.msra.mxu1 %v2392_v13  ;;  %2091 = vmatprep.mubr.msk.f32.mxu1 %vm2349_vm2, %v2347_v0 }
 0x595   :  { %2085 = vmatprep.subr.mxu1 %v2347_v0 }
 0x596   :  { %2086 = vmatpush3.msra.mxu1 %v2396_v16 }
 0x597   :  { %2087 = vmatprep.subr.mxu1 %v2347_v0 }
 0x598   :  { %2088 = vmatpush3.msra.mxu1 %v2400_v19 }
 0x599   :  { %2089 = vmatprep.subr.mxu1 %v2347_v0 }
 0x59a   :  { %2090 = vmatpush3.msra.mxu1 %v2408_v21 }
 0x59b   :  { %2105 = vmatprep.subr.mxu1 %v2347_v0 }
 0x653   :  { %v426_v61 = vpop.f32.mrf.mxu1 }
 0x654   :  { %v431_v62 = vrot.slane %v426_v61, 4 }
 0x655   :  { %v2071_v63 = vpop.f32.mrf.mxu1 }
 0x656   :  { %v433_v1 = vadd.f32 %v431_v62, %v2444_v29 }
 0x658   :  { %2243 = vtanh.f32 %v433_v1 }
 0x665   :  { %v2244_v2 = vpop.eup %2243 }
 0x666   :  { %442 = vrot.lane.b32.xlu0 %v2244_v2, %s2350_s30  ;;  %v435_v3 = vadd.f32 1.0, %v2244_v2 }
 0x668   :  { %v436_v4 = vmul.f32 0.5, %v435_v3 }
 0x66a   :  { %v440_v8 = vmul.f32 %v438_v7, %v436_v4 }
 0x6d8   :  { %v443_v5 = vpop.permute.xlu0 %442 }
 0x6d9   :  { %v445_v6 = vmul.f32 %v443_v5, %v436_v4 }
 0x6db   :  { %447 = vrot.lane.b32.xlu1 %v445_v6, %s2351_s5 }
 0x74d   :  { %v448_v10 = vpop.permute.xlu1 %447 }
 0x74e   :  { %v450_v11 = vadd.f32 %v448_v10, %v440_v8 }
 0x750   :  { %2245 = vtanh.f32 %v450_v11  ;;  %v541_v34 = vrot.slane %v450_v11, 6 }
 0x75d   :  { %v2246_v12 = vpop.eup %2245 }
 0x75e   :  { %453 = vrot.lane.b32.xlu0 %v2246_v12, %s2350_s30 }
 0x7d0   :  { %v454_v14 = vpop.permute.xlu0 %453 }
 0x7d1   :  { %v456_v15 = vmul.f32 %v454_v14, %v436_v4 }
 0x7d3   :  { %v458_v18 = vrot.slane %v456_v15, 4  ;;  %v971_v20 = vsel %vm970_vm5, %v969_v17, %v456_v15 }
 0x7d5   :  { %459 = vrot.lane.b32.xlu1 %v458_v18, %s2351_s5 }
 0x847   :  { %v460_v22 = vpop.permute.xlu1 %459 }
 0x848   :  { %2081 = vmatmul.mubr.msk.f32.vlgmr.msra.gmra.mxu0 %vm74_vm3, %v460_v22 }
 0x849   :  { %2095 = vmatpush3.msra.mxu0 %v2392_v13  ;;  %2102 = vmatprep.mubr.msk.f32.mxu0 %vm2349_vm2, %v2347_v0 }
 0x84a   :  { %2096 = vmatprep.subr.mxu0 %v2347_v0 }
 0x84b   :  { %2097 = vmatpush3.msra.mxu0 %v2396_v16 }
 0x84c   :  { %2098 = vmatprep.subr.mxu0 %v2347_v0 }
 0x84d   :  { %2099 = vmatpush3.msra.mxu0 %v2400_v19 }
 0x84e   :  { %2100 = vmatprep.subr.mxu0 %v2347_v0 }
 0x84f   :  { %2101 = vmatpush3.msra.mxu0 %v2408_v21 }
 0x850   :  { %2116 = vmatprep.subr.mxu0 %v2347_v0 }
 0x908   :  { %v529_v23 = vpop.f32.mrf.mxu0 }
 0x909   :  { %v534_v25 = vrot.slane %v529_v23, 2 }
 0x90a   :  { %v2082_v26 = vpop.f32.mrf.mxu0 }
 0x90b   :  { %v536_v27 = vadd.f32 %v534_v25, %v2444_v29 }
 0x90d   :  { %2247 = vtanh.f32 %v536_v27 }
 0x91a   :  { %v2248_v28 = vpop.eup %2247 }
 0x91b   :  { %545 = vrot.lane.b32.xlu0 %v2248_v28, %s2350_s30  ;;  %v538_v30 = vadd.f32 1.0, %v2248_v28 }
 0x91d   :  { %v539_v31 = vmul.f32 0.5, %v538_v30 }
 0x91f   :  { %v543_v35 = vmul.f32 %v541_v34, %v539_v31 }
 0x98d   :  { %v546_v32 = vpop.permute.xlu0 %545 }
 0x98e   :  { %v548_v33 = vmul.f32 %v546_v32, %v539_v31 }
 0x990   :  { %550 = vrot.lane.b32.xlu1 %v548_v33, %s2351_s5 }
 0xa02   :  { %v551_v36 = vpop.permute.xlu1 %550 }
 0xa03   :  { %v553_v37 = vadd.f32 %v551_v36, %v543_v35 }
 0xa05   :  { %2249 = vtanh.f32 %v553_v37  ;;  %v641_v52 = vrot.slane %v553_v37, 6 }
 0xa12   :  { %v2250_v38 = vpop.eup %2249 }
 0xa13   :  { %556 = vrot.lane.b32.xlu0 %v2250_v38, %s2350_s30 }
 0xa85   :  { %v557_v39 = vpop.permute.xlu0 %556 }
 0xa86   :  { %v559_v29 = vmul.f32 %v557_v39, %v539_v31 }
 0xa88   :  { %v561_v40 = vrot.slane %v559_v29, 6  ;;  %v2505_v41 = vsel %vm972_vm6, %v971_v20, %v559_v29 }
 0xa8a   :  { %562 = vrot.lane.b32.xlu1 %v561_v40, %s2351_s5 }
 0xafc   :  { %v563_v42 = vpop.permute.xlu1 %562 }
 0xafd   :  { %2092 = vmatmul.mubr.msk.f32.vlgmr.msra.gmra.mxu1 %vm74_vm3, %v563_v42 }
 0xafe   :  { %2106 = vmatpush3.msra.mxu1 %v2392_v13  ;;  %2113 = vmatprep.mubr.msk.f32.mxu1 %vm2349_vm2, %v2347_v0 }
 0xaff   :  { %2107 = vmatprep.subr.mxu1 %v2347_v0 }
 0xb00   :  { %2108 = vmatpush3.msra.mxu1 %v2396_v16 }
 0xb01   :  { %2109 = vmatprep.subr.mxu1 %v2347_v0 }
 0xb02   :  { %2110 = vmatpush3.msra.mxu1 %v2400_v19 }
 0xb03   :  { %2111 = vmatprep.subr.mxu1 %v2347_v0 }
 0xb04   :  { %2112 = vmatpush3.msra.mxu1 %v2408_v21 }
 0xbbd   :  { %v632_v44 = vpop.f32.mrf.mxu1 }
 0xbbe   :  { %v636_v45 = vadd.f32 %v632_v44, %v2520_v43 }
 0xbbf   :  { %v2093_v46 = vpop.f32.mrf.mxu1 }
 0xbc0   :  { %2251 = vtanh.f32 %v636_v45 }
 0xbcd   :  { %v2252_v47 = vpop.eup %2251 }
 0xbce   :  { %645 = vrot.lane.b32.xlu0 %v2252_v47, %s2350_s30  ;;  %v638_v48 = vadd.f32 1.0, %v2252_v47 }
 0xbd0   :  { %v639_v49 = vmul.f32 0.5, %v638_v48 }
 0xbd2   :  { %v643_v53 = vmul.f32 %v641_v52, %v639_v49  ;;  %v980_v52 = vld [vmem:[#allocation2 + $0x30] sm:$0xff] }
 0xc40   :  { %v646_v50 = vpop.permute.xlu0 %645 }
 0xc41   :  { %v648_v51 = vmul.f32 %v646_v50, %v639_v49 }
 0xc43   :  { %650 = vrot.lane.b32.xlu1 %v648_v51, %s2351_s5 }
 0xcb5   :  { %v651_v54 = vpop.permute.xlu1 %650 }
 0xcb6   :  { %v653_v55 = vadd.f32 %v651_v54, %v643_v53  ;;  %v986_v53 = vld [vmem:[#allocation4 + $0x38] sm:$0xff]  ;;  %v985_v54 = vld [vmem:[#allocation4 + $0x30] sm:$0xff] }
 0xcb8   :  { %2253 = vtanh.f32 %v653_v55 }
 0xcc5   :  { %v2254_v24 = vpop.eup %2253 }
 0xcc6   :  { %656 = vrot.lane.b32.xlu0 %v2254_v24, %s2350_s30  ;;  %v2563_v24 = vmul.f32 %v986_v53, %v2386_v9 }
 0xd38   :  { %v657_v56 = vpop.permute.xlu0 %656 }
 0xd39   :  { %v659_v57 = vmul.f32 %v657_v56, %v639_v49  ;;  %v978_v56 = vld [vmem:[#allocation2 + $0x20] sm:$0xff] }
 0xd3b   :  { %661 = vrot.lane.b32.xlu1 %v659_v57, %s2351_s5 }
 0xdad   :  { %v662_v58 = vpop.permute.xlu1 %661 }
 0xdae   :  { %2103 = vmatmul.mubr.msk.f32.vlgmr.msra.gmra.mxu0 %vm74_vm3, %v662_v58  ;;  %v984_v58 = vld [vmem:[#allocation4 + $0x28] sm:$0xff] }
 0xdaf   :  { %2117 = vmatpush3.msra.mxu0 %v2392_v13  ;;  %2124 = vmatprep.mubr.msk.f32.mxu0 %vm2349_vm2, %v2347_v0 }
 0xdb0   :  { %2118 = vmatprep.subr.mxu0 %v2347_v0 }
 0xdb1   :  { %2119 = vmatpush3.msra.mxu0 %v2396_v16 }
 0xdb2   :  { %2120 = vmatprep.subr.mxu0 %v2347_v0 }
 0xdb3   :  { %2121 = vmatpush3.msra.mxu0 %v2400_v19  ;;  %v743_v19 = vrot.slane %v653_v55, 6  ;;  %v979_v55 = vld [vmem:[#allocation2 + $0x28] sm:$0xff] }
 0xdb4   :  { %2122 = vmatprep.subr.mxu0 %v2347_v0 }
 0xdb5   :  { %2123 = vmatpush3.msra.mxu0 %v2408_v21 }
 0xdb6   :  { %2138 = vmatprep.subr.mxu0 %v2347_v0 }
 0xe6e   :  { %v731_v59 = vpop.f32.mrf.mxu0 }
 0xe6f   :  { %v736_v60 = vrot.slane %v731_v59, 6  ;;  %v2575_v59 = vmul.f32 %v984_v58, %v2386_v9 }
 0xe70   :  { %v2104_v13 = vpop.f32.mrf.mxu0 }
 0xe71   :  { %v738_v61 = vadd.f32 %v736_v60, %v2520_v43  ;;  %v983_v60 = vld [vmem:[#allocation4 + $0x20] sm:$0xff] }
 0xe72   :  { %v2579_v13 = vmul.f32 %v983_v60, %v2386_v9 }
 0xe73   :  { %2255 = vtanh.f32 %v738_v61 }
 0xe80   :  { %v2256_v62 = vpop.eup %2255 }
 0xe81   :  { %747 = vrot.lane.b32.xlu0 %v2256_v62, %s2350_s30  ;;  %v740_v16 = vadd.f32 1.0, %v2256_v62 }
 0xe83   :  { %v741_v63 = vmul.f32 0.5, %v740_v16 }
 0xe85   :  { %v745_v3 = vmul.f32 %v743_v19, %v741_v63  ;;  %v1926_v19 = vld [vmem:[%s2741_s3 + $0x1] ss:$0 sm:$0xff] }
 0xef3   :  { %v748_v1 = vpop.permute.xlu0 %747 }
 0xef4   :  { %v750_v2 = vmul.f32 %v748_v1, %v741_v63 }
 0xef6   :  { %752 = vrot.lane.b32.xlu1 %v750_v2, %s2351_s5 }
 0xf68   :  { %v753_v21 = vpop.permute.xlu1 %752 }
 0xf69   :  { %v755_v4 = vadd.f32 %v753_v21, %v745_v3 }
 0xf6b   :  { %2257 = vtanh.f32 %v755_v4  ;;  %v846_v25 = vrot.slane %v755_v4, 6 }
 0xf78   :  { %v2258_v5 = vpop.eup %2257 }
 0xf79   :  { %758 = vrot.lane.b32.xlu0 %v2258_v5, %s2350_s30 }
 0xfeb   :  { %v759_v6 = vpop.permute.xlu0 %758 }
 0xfec   :  { %v761_v7 = vmul.f32 %v759_v6, %v741_v63 }
 0xfee   :  { %v763_v8 = vrot.slane %v761_v7, 2  ;;  %v974_v33 = vsel %vm968_vm4, %v659_v57, %v761_v7 }
 0xff0   :  { %764 = vrot.lane.b32.xlu1 %v763_v8, %s2351_s5 }
0x1062   :  { %v765_v10 = vpop.permute.xlu1 %764 }
0x1063   :  { %2114 = vmatmul.mubr.msk.f32.vlgmr.msra.gmra.mxu1 %vm74_vm3, %v765_v10 }
0x1123   :  { %v834_v11 = vpop.f32.mrf.mxu1 }
0x1124   :  { %v839_v12 = vrot.slane %v834_v11, 4 }
0x1125   :  { %v2115_v14 = vpop.f32.mrf.mxu1 }
0x1126   :  { %v841_v15 = vadd.f32 %v839_v12, %v2520_v43 }
0x1128   :  { %2259 = vtanh.f32 %v841_v15 }
0x1135   :  { %v2260_v17 = vpop.eup %2259 }
0x1136   :  { %850 = vrot.lane.b32.xlu0 %v2260_v17, %s2350_s30  ;;  %v843_v18 = vadd.f32 1.0, %v2260_v17 }
0x1138   :  { %v844_v20 = vmul.f32 0.5, %v843_v18 }
0x113a   :  { %v848_v26 = vmul.f32 %v846_v25, %v844_v20 }
0x11a8   :  { %v851_v22 = vpop.permute.xlu0 %850 }
0x11a9   :  { %v853_v23 = vmul.f32 %v851_v22, %v844_v20 }
0x11ab   :  { %855 = vrot.lane.b32.xlu1 %v853_v23, %s2351_s5 }
0x121d   :  { %v856_v27 = vpop.permute.xlu1 %855 }
0x121e   :  { %v858_v28 = vadd.f32 %v856_v27, %v848_v26 }
0x1220   :  { %2261 = vtanh.f32 %v858_v28  ;;  %v949_v47 = vrot.slane %v858_v28, 6 }
0x122d   :  { %v2262_v30 = vpop.eup %2261 }
0x122e   :  { %861 = vrot.lane.b32.xlu0 %v2262_v30, %s2350_s30 }
0x12a0   :  { %v862_v31 = vpop.permute.xlu0 %861 }
0x12a1   :  { %v864_v32 = vmul.f32 %v862_v31, %v844_v20 }
0x12a3   :  { %v866_v34 = vrot.slane %v864_v32, 4  ;;  %v2550_v35 = vsel %vm970_vm5, %v974_v33, %v864_v32 }
0x12a5   :  { %867 = vrot.lane.b32.xlu1 %v866_v34, %s2351_s5 }
0x1317   :  { %v868_v36 = vpop.permute.xlu1 %867 }
0x1318   :  { %2125 = vmatmul.mubr.msk.f32.vlgmr.msra.gmra.mxu0 %vm74_vm3, %v868_v36 }
0x1319   :  { %2146 = vmatprep.mubr.msk.f32.mxu0 %vm2349_vm2, %v2347_v0  ;;  %2139 = vmatpush3.msra.mxu0 %v2563_v24 }
0x131a   :  { %2140 = vmatprep.subr.mxu0 %v2347_v0 }
0x13d8   :  { %v937_v37 = vpop.f32.mrf.mxu0 }
0x13d9   :  { %v942_v38 = vrot.slane %v937_v37, 2 }
0x13da   :  { %v2126_v39 = vpop.f32.mrf.mxu0 }
0x13db   :  { %v944_v29 = vadd.f32 %v942_v38, %v2520_v43  ;;  %v981_v43 = vld [vmem:[#allocation2 + $0x38] sm:$0xff] }
0x13dc   :  { %2127 = vmatprep.subr.mxu1 %v981_v43 }
0x13dd   :  { %2263 = vtanh.f32 %v944_v29  ;;  %2128 = vmatpush3.msra.mxu1 %v981_v43 }
0x13de   :  { %2129 = vmatprep.subr.mxu1 %v980_v52 }
0x13df   :  { %2130 = vmatpush3.msra.mxu1 %v980_v52 }
0x13e0   :  { %2131 = vmatprep.subr.mxu1 %v979_v55 }
0x13e1   :  { %2132 = vmatpush3.msra.mxu1 %v979_v55 }
0x13e2   :  { %2133 = vmatprep.subr.mxu1 %v978_v56 }
0x13e3   :  { %2134 = vmatpush3.msra.mxu1 %v978_v56 }
0x13e4   :  { %2149 = vmatprep.subr.mxu1 %v2347_v0 }
0x13ea   :  { %v2264_v40 = vpop.eup %2263 }
0x13eb   :  { %953 = vrot.lane.b32.xlu0 %v2264_v40, %s2350_s30  ;;  %v946_v42 = vadd.f32 1.0, %v2264_v40 }
0x13ed   :  { %v947_v44 = vmul.f32 0.5, %v946_v42 }
0x13ef   :  { %v951_v48 = vmul.f32 %v949_v47, %v947_v44 }
0x145d   :  { %v954_v45 = vpop.permute.xlu0 %953 }
0x145e   :  { %v956_v46 = vmul.f32 %v954_v45, %v947_v44 }
0x1460   :  { %958 = vrot.lane.b32.xlu1 %v956_v46, %s2351_s5 }
0x1464   :  { %1001 = vrot.lane.b32.xlu1 %v2505_v41, %s2351_s5  ;;  %v2566_v41 = vmul.f32 %v985_v54, %v2386_v9 }
0x1466   :  { %2141 = vmatpush3.msra.mxu0 %v2566_v41 }
0x1467   :  { %2142 = vmatprep.subr.mxu0 %v2347_v0 }
0x1468   :  { %2143 = vmatpush3.msra.mxu0 %v2575_v59 }
0x1469   :  { %2144 = vmatprep.subr.mxu0 %v2347_v0 }
0x146a   :  { %2145 = vmatpush3.msra.mxu0 %v2579_v13 }
0x146b   :  { %2147 = vmatmul.mubr.f32.vlgmr.msra.gmra.mxu0 %v2347_v0  ;;  %2160 = vmatprep.subr.mxu0 %v2347_v0 }
0x146c   :  { %2161 = vmatpush3.msra.mxu0 %v2563_v24  ;;  %2168 = vmatprep.mubr.msk.f32.mxu0 %vm2349_vm2, %v2347_v0 }
0x146d   :  { %2162 = vmatprep.subr.mxu0 %v2347_v0 }
0x146e   :  { %2163 = vmatpush3.msra.mxu0 %v2566_v41 }
0x146f   :  { %2164 = vmatprep.subr.mxu0 %v2347_v0 }
0x1470   :  { %2165 = vmatpush3.msra.mxu0 %v2575_v59 }
0x1471   :  { %2166 = vmatprep.subr.mxu0 %v2347_v0 }
0x1472   :  { %2167 = vmatpush3.msra.mxu0 %v2579_v13 }
0x1473   :  { %2182 = vmatprep.subr.mxu0 %v2347_v0 }
0x14d2   :  { %v959_v49 = vpop.permute.xlu1 %958 }
0x14d3   :  { %v961_v50 = vadd.f32 %v959_v49, %v951_v48 }
0x14d5   :  { %2265 = vtanh.f32 %v961_v50 }
0x14d6   :  { %v1002_v51 = vpop.permute.xlu1 %1001 }
0x14d7   :  { %2135 = vmatprep.mubr.msk.f32.mxu1 %vm74_vm3, %v1002_v51 }
0x14e2   :  { %v2266_v57 = vpop.eup %2265 }
0x14e3   :  { %964 = vrot.lane.b32.xlu0 %v2266_v57, %s2350_s30 }
0x152b   :  { %v1152_v1 = vpop.f32.mrf.mxu0 }
0x152d   :  { %v2148_v2 = vpop.f32.mrf.mxu0 }
0x1555   :  { %v965_v61 = vpop.permute.xlu0 %964 }
0x1556   :  { %v967_v62 = vmul.f32 %v965_v61, %v947_v44 }
0x1558   :  { %v976_v16 = vsel %vm972_vm6, %v2550_v35, %v967_v62 }
0x1559   :  { %1003 = vrot.lane.b32.xlu0 %v976_v16, %s2351_s5 }
0x15cb   :  { %v1004_v63 = vpop.permute.xlu0 %1003 }
0x15cc   :  { %2136 = vmatmul.mubr.msk.f32.vlgmr.msra.gmra.mxu1 %vm74_vm3, %v1004_v63 }
0x15cd   :  { %2150 = vmatpush3.msra.mxu1 %v2563_v24  ;;  %2157 = vmatprep.mubr.msk.f32.mxu1 %vm2349_vm2, %v2347_v0 }
0x15ce   :  { %2151 = vmatprep.subr.mxu1 %v2347_v0 }
0x15cf   :  { %2152 = vmatpush3.msra.mxu1 %v2566_v41 }
0x15d0   :  { %2153 = vmatprep.subr.mxu1 %v2347_v0 }
0x15d1   :  { %2154 = vmatpush3.msra.mxu1 %v2575_v59 }
0x15d2   :  { %2155 = vmatprep.subr.mxu1 %v2347_v0 }
0x15d3   :  { %2156 = vmatpush3.msra.mxu1 %v2579_v13 }
0x15d4   :  { %2171 = vmatprep.subr.mxu1 %v2347_v0 }
0x168c   :  { %v2137_v3 = vpop.f32.mrf.mxu1 }
0x168d   :  { %v2612_v21 = vadd.f32 %v2137_v3, %v1926_v19 }
0x168e   :  { %v1075_v4 = vpop.f32.mrf.mxu1 }
0x168f   :  { %v1076_v5 = vadd.f32 %v1926_v19, %v1075_v4 }
0x1691   :  { %v2615_v6 = vmul.f32 %v1076_v5, %v2386_v9 }
0x1693   :  { %v1156_v7 = vadd.f32 %v1152_v1, %v2615_v6 }
0x1695   :  { %2267 = vtanh.f32 %v1156_v7 }
0x16a2   :  { %v2268_v8 = vpop.eup %2267 }
0x16a3   :  { %1162 = vrot.lane.b32.xlu1 %v2268_v8, %s2350_s30  ;;  %v1158_v10 = vadd.f32 1.0, %v2268_v8 }
0x16a5   :  { %v1159_v11 = vmul.f32 0.5, %v1158_v10 }
0x16a7   :  { %v1160_v15 = vmul.f32 0.0, %v1159_v11 }
0x1715   :  { %v1163_v12 = vpop.permute.xlu1 %1162 }
0x1716   :  { %v1165_v14 = vmul.f32 %v1163_v12, %v1159_v11 }
0x1718   :  { %1167 = vrot.lane.b32.xlu0 %v1165_v14, %s2351_s5 }
0x178a   :  { %v1168_v17 = vpop.permute.xlu0 %1167 }
0x178b   :  { %v1170_v18 = vadd.f32 %v1168_v17, %v1160_v15 }
0x178d   :  { %2269 = vtanh.f32 %v1170_v18  ;;  %v1260_v36 = vrot.slane %v1170_v18, 6 }
0x179a   :  { %v2270_v20 = vpop.eup %2269 }
0x179b   :  { %1173 = vrot.lane.b32.xlu1 %v2270_v20, %s2350_s30 }
0x180d   :  { %v1174_v22 = vpop.permute.xlu1 %1173 }
0x180e   :  { %v2621_v23 = vmul.f32 %v1174_v22, %v1159_v11 }
0x1810   :  { %1178 = vrot.lane.b32.xlu0 %v2621_v23, %s2351_s5 }
0x1882   :  { %v1179_v25 = vpop.permute.xlu0 %1178 }
0x1883   :  { %2158 = vmatmul.mubr.msk.f32.vlgmr.msra.gmra.mxu1 %vm74_vm3, %v1179_v25 }
0x1884   :  { %2172 = vmatpush3.msra.mxu1 %v2563_v24  ;;  %2179 = vmatprep.mubr.msk.f32.mxu1 %vm2349_vm2, %v2347_v0 }
0x1885   :  { %2173 = vmatprep.subr.mxu1 %v2347_v0 }
0x1886   :  { %2174 = vmatpush3.msra.mxu1 %v2566_v41 }
0x1887   :  { %2175 = vmatprep.subr.mxu1 %v2347_v0 }
0x1888   :  { %2176 = vmatpush3.msra.mxu1 %v2575_v59 }
0x1889   :  { %2177 = vmatprep.subr.mxu1 %v2347_v0 }
0x188a   :  { %2178 = vmatpush3.msra.mxu1 %v2579_v13 }
0x188b   :  { %2193 = vmatprep.subr.mxu1 %v2347_v0 }
0x1943   :  { %v1248_v26 = vpop.f32.mrf.mxu1 }
0x1944   :  { %v1253_v27 = vrot.slane %v1248_v26, 6  ;;  %v2691_v26 = vmul.f32 %v2612_v21, %v2386_v9 }
0x1945   :  { %v2159_v28 = vpop.f32.mrf.mxu1 }
0x1946   :  { %v1255_v30 = vadd.f32 %v1253_v27, %v2615_v6 }
0x1948   :  { %2271 = vtanh.f32 %v1255_v30 }
0x1955   :  { %v2272_v31 = vpop.eup %2271 }
0x1956   :  { %1264 = vrot.lane.b32.xlu1 %v2272_v31, %s2350_s30  ;;  %v1257_v32 = vadd.f32 1.0, %v2272_v31 }
0x1958   :  { %v1258_v33 = vmul.f32 0.5, %v1257_v32 }
0x195a   :  { %v1262_v37 = vmul.f32 %v1260_v36, %v1258_v33 }
0x19c8   :  { %v1265_v34 = vpop.permute.xlu1 %1264 }
0x19c9   :  { %v1267_v35 = vmul.f32 %v1265_v34, %v1258_v33 }
0x19cb   :  { %1269 = vrot.lane.b32.xlu0 %v1267_v35, %s2351_s5 }
0x1a3d   :  { %v1270_v38 = vpop.permute.xlu0 %1269 }
0x1a3e   :  { %v1272_v39 = vadd.f32 %v1270_v38, %v1262_v37 }
0x1a40   :  { %2273 = vtanh.f32 %v1272_v39  ;;  %v1363_v54 = vrot.slane %v1272_v39, 6 }
0x1a4d   :  { %v2274_v29 = vpop.eup %2273 }
0x1a4e   :  { %1275 = vrot.lane.b32.xlu1 %v2274_v29, %s2350_s30 }
0x1ac0   :  { %v1276_v40 = vpop.permute.xlu1 %1275 }
0x1ac1   :  { %v1278_v42 = vmul.f32 %v1276_v40, %v1258_v33 }
0x1ac3   :  { %v1280_v44 = vrot.slane %v1278_v42, 2  ;;  %v1893_v62 = vsel %vm968_vm4, %v2621_v23, %v1278_v42 }
0x1ac5   :  { %1281 = vrot.lane.b32.xlu0 %v1280_v44, %s2351_s5 }
0x1b37   :  { %v1282_v45 = vpop.permute.xlu0 %1281 }
0x1b38   :  { %2169 = vmatmul.mubr.msk.f32.vlgmr.msra.gmra.mxu0 %vm74_vm3, %v1282_v45 }
0x1b39   :  { %2183 = vmatpush3.msra.mxu0 %v2563_v24  ;;  %2190 = vmatprep.mubr.msk.f32.mxu0 %vm2349_vm2, %v2347_v0 }
0x1b3a   :  { %2184 = vmatprep.subr.mxu0 %v2347_v0 }
0x1b3b   :  { %2185 = vmatpush3.msra.mxu0 %v2566_v41 }
0x1b3c   :  { %2186 = vmatprep.subr.mxu0 %v2347_v0 }
0x1b3d   :  { %2187 = vmatpush3.msra.mxu0 %v2575_v59 }
0x1b3e   :  { %2188 = vmatprep.subr.mxu0 %v2347_v0 }
0x1b3f   :  { %2189 = vmatpush3.msra.mxu0 %v2579_v13 }
0x1b40   :  { %2204 = vmatprep.subr.mxu0 %v2347_v0 }
0x1bf8   :  { %v1351_v46 = vpop.f32.mrf.mxu0 }
0x1bf9   :  { %v1356_v47 = vrot.slane %v1351_v46, 4 }
0x1bfa   :  { %v2170_v48 = vpop.f32.mrf.mxu0 }
0x1bfb   :  { %v1358_v49 = vadd.f32 %v1356_v47, %v2615_v6 }
0x1bfd   :  { %2275 = vtanh.f32 %v1358_v49 }
0x1c0a   :  { %v2276_v50 = vpop.eup %2275 }
0x1c0b   :  { %1367 = vrot.lane.b32.xlu1 %v2276_v50, %s2350_s30  ;;  %v1360_v51 = vadd.f32 1.0, %v2276_v50 }
0x1c0d   :  { %v1361_v43 = vmul.f32 0.5, %v1360_v51 }
0x1c0f   :  { %v1365_v55 = vmul.f32 %v1363_v54, %v1361_v43 }
0x1c7d   :  { %v1368_v52 = vpop.permute.xlu1 %1367 }
0x1c7e   :  { %v1370_v53 = vmul.f32 %v1368_v52, %v1361_v43 }
0x1c80   :  { %1372 = vrot.lane.b32.xlu0 %v1370_v53, %s2351_s5 }
0x1cf2   :  { %v1373_v56 = vpop.permute.xlu0 %1372 }
0x1cf3   :  { %v1375_v57 = vadd.f32 %v1373_v56, %v1365_v55 }
0x1cf5   :  { %2277 = vtanh.f32 %v1375_v57  ;;  %v1466_v12 = vrot.slane %v1375_v57, 6 }
0x1d02   :  { %v2278_v58 = vpop.eup %2277 }
0x1d03   :  { %1378 = vrot.lane.b32.xlu1 %v2278_v58, %s2350_s30 }
0x1d75   :  { %v1379_v60 = vpop.permute.xlu1 %1378 }
0x1d76   :  { %v1381_v61 = vmul.f32 %v1379_v60, %v1361_v43 }
0x1d78   :  { %v1383_v16 = vrot.slane %v1381_v61, 4  ;;  %v1894_v63 = vsel %vm970_vm5, %v1893_v62, %v1381_v61 }
0x1d7a   :  { %1384 = vrot.lane.b32.xlu0 %v1383_v16, %s2351_s5 }
0x1dec   :  { %v1385_v1 = vpop.permute.xlu0 %1384 }
0x1ded   :  { %2180 = vmatmul.mubr.msk.f32.vlgmr.msra.gmra.mxu1 %vm74_vm3, %v1385_v1 }
0x1dee   :  { %2194 = vmatpush3.msra.mxu1 %v2563_v24  ;;  %2201 = vmatprep.mubr.msk.f32.mxu1 %vm2349_vm2, %v2347_v0 }
0x1def   :  { %2195 = vmatprep.subr.mxu1 %v2347_v0 }
0x1df0   :  { %2196 = vmatpush3.msra.mxu1 %v2566_v41 }
0x1df1   :  { %2197 = vmatprep.subr.mxu1 %v2347_v0 }
0x1df2   :  { %2198 = vmatpush3.msra.mxu1 %v2575_v59 }
0x1df3   :  { %2199 = vmatprep.subr.mxu1 %v2347_v0 }
0x1df4   :  { %2200 = vmatpush3.msra.mxu1 %v2579_v13 }
0x1df5   :  { %2215 = vmatprep.subr.mxu1 %v2347_v0 }
0x1ead   :  { %v1454_v2 = vpop.f32.mrf.mxu1 }
0x1eae   :  { %v1459_v19 = vrot.slane %v1454_v2, 2 }
0x1eaf   :  { %v2181_v3 = vpop.f32.mrf.mxu1 }
0x1eb0   :  { %v1461_v4 = vadd.f32 %v1459_v19, %v2615_v6 }
0x1eb2   :  { %2279 = vtanh.f32 %v1461_v4 }
0x1ebf   :  { %v2280_v5 = vpop.eup %2279 }
0x1ec0   :  { %1470 = vrot.lane.b32.xlu1 %v2280_v5, %s2350_s30  ;;  %v1463_v7 = vadd.f32 1.0, %v2280_v5 }
0x1ec2   :  { %v1464_v8 = vmul.f32 0.5, %v1463_v7 }
0x1ec4   :  { %v1468_v14 = vmul.f32 %v1466_v12, %v1464_v8 }
0x1f32   :  { %v1471_v10 = vpop.permute.xlu1 %1470 }
0x1f33   :  { %v1473_v11 = vmul.f32 %v1471_v10, %v1464_v8 }
0x1f35   :  { %1475 = vrot.lane.b32.xlu0 %v1473_v11, %s2351_s5 }
0x1fa7   :  { %v1476_v15 = vpop.permute.xlu0 %1475 }
0x1fa8   :  { %v1478_v17 = vadd.f32 %v1476_v15, %v1468_v14 }
0x1faa   :  { %2281 = vtanh.f32 %v1478_v17  ;;  %v1566_v36 = vrot.slane %v1478_v17, 6 }
0x1fb7   :  { %v2282_v18 = vpop.eup %2281 }
0x1fb8   :  { %1481 = vrot.lane.b32.xlu1 %v2282_v18, %s2350_s30 }
0x202a   :  { %v1482_v20 = vpop.permute.xlu1 %1481 }
0x202b   :  { %v1484_v6 = vmul.f32 %v1482_v20, %v1464_v8 }
0x202d   :  { %v1486_v22 = vrot.slane %v1484_v6, 6  ;;  %v2676_v23 = vsel %vm972_vm6, %v1894_v63, %v1484_v6 }
0x202f   :  { %1487 = vrot.lane.b32.xlu0 %v1486_v22, %s2351_s5 }
0x20a1   :  { %v1488_v25 = vpop.permute.xlu0 %1487 }
0x20a2   :  { %2191 = vmatmul.mubr.msk.f32.vlgmr.msra.gmra.mxu0 %vm74_vm3, %v1488_v25 }
0x20a3   :  { %2205 = vmatpush3.msra.mxu0 %v2563_v24  ;;  %2212 = vmatprep.mubr.msk.f32.mxu0 %vm2349_vm2, %v2347_v0 }
0x20a4   :  { %2206 = vmatprep.subr.mxu0 %v2347_v0 }
0x20a5   :  { %2207 = vmatpush3.msra.mxu0 %v2566_v41 }
0x20a6   :  { %2208 = vmatprep.subr.mxu0 %v2347_v0 }
0x20a7   :  { %2209 = vmatpush3.msra.mxu0 %v2575_v59 }
0x20a8   :  { %2210 = vmatprep.subr.mxu0 %v2347_v0 }
0x20a9   :  { %2211 = vmatpush3.msra.mxu0 %v2579_v13 }
0x2162   :  { %v1557_v27 = vpop.f32.mrf.mxu0 }
0x2163   :  { %v1561_v28 = vadd.f32 %v1557_v27, %v2691_v26 }
0x2164   :  { %v2192_v30 = vpop.f32.mrf.mxu0 }
0x2165   :  { %2283 = vtanh.f32 %v1561_v28 }
0x2172   :  { %v2284_v31 = vpop.eup %2283 }
0x2173   :  { %1570 = vrot.lane.b32.xlu1 %v2284_v31, %s2350_s30  ;;  %v1563_v32 = vadd.f32 1.0, %v2284_v31 }
0x2175   :  { %v1564_v33 = vmul.f32 0.5, %v1563_v32 }
0x2177   :  { %v1568_v37 = vmul.f32 %v1566_v36, %v1564_v33 }
0x21e5   :  { %v1571_v34 = vpop.permute.xlu1 %1570 }
0x21e6   :  { %v1573_v35 = vmul.f32 %v1571_v34, %v1564_v33 }
0x21e8   :  { %1575 = vrot.lane.b32.xlu0 %v1573_v35, %s2351_s5 }
0x225a   :  { %v1576_v38 = vpop.permute.xlu0 %1575 }
0x225b   :  { %v1578_v39 = vadd.f32 %v1576_v38, %v1568_v37 }
0x225d   :  { %2285 = vtanh.f32 %v1578_v39 }
0x226a   :  { %v2286_v9 = vpop.eup %2285 }
0x226b   :  { %1581 = vrot.lane.b32.xlu1 %v2286_v9, %s2350_s30 }
0x22dd   :  { %v1582_v21 = vpop.permute.xlu1 %1581 }
0x22de   :  { %v1584_v29 = vmul.f32 %v1582_v21, %v1564_v33 }
0x22e0   :  { %1586 = vrot.lane.b32.xlu0 %v1584_v29, %s2351_s5 }
0x2352   :  { %v1587_v40 = vpop.permute.xlu0 %1586 }
0x2353   :  { %2202 = vmatmul.mubr.msk.f32.vlgmr.msra.gmra.mxu1 %vm74_vm3, %v1587_v40 }
0x2354   :  { %2216 = vmatpush3.msra.mxu1 %v2563_v24  ;;  %2223 = vmatprep.mubr.msk.f32.mxu1 %vm2349_vm2, %v2347_v0 }
0x2355   :  { %2217 = vmatprep.subr.mxu1 %v2347_v0 }
0x2356   :  { %2218 = vmatpush3.msra.mxu1 %v2566_v41 }
0x2357   :  { %2219 = vmatprep.subr.mxu1 %v2347_v0 }
0x2358   :  { %2220 = vmatpush3.msra.mxu1 %v2575_v59  ;;  %v1668_v59 = vrot.slane %v1578_v39, 6 }
0x2359   :  { %2221 = vmatprep.subr.mxu1 %v2347_v0 }
0x235a   :  { %2222 = vmatpush3.msra.mxu1 %v2579_v13 }
0x2413   :  { %v1656_v42 = vpop.f32.mrf.mxu1 }
0x2414   :  { %v1661_v44 = vrot.slane %v1656_v42, 6 }
0x2415   :  { %v2203_v45 = vpop.f32.mrf.mxu1 }
0x2416   :  { %v1663_v24 = vadd.f32 %v1661_v44, %v2691_v26 }
0x2418   :  { %2287 = vtanh.f32 %v1663_v24 }
0x2425   :  { %v2288_v46 = vpop.eup %2287 }
0x2426   :  { %1672 = vrot.lane.b32.xlu1 %v2288_v46, %s2350_s30  ;;  %v1665_v47 = vadd.f32 1.0, %v2288_v46 }
0x2428   :  { %v1666_v48 = vmul.f32 0.5, %v1665_v47 }
0x242a   :  { %v1670_v50 = vmul.f32 %v1668_v59, %v1666_v48 }
0x2498   :  { %v1673_v41 = vpop.permute.xlu1 %1672 }
0x2499   :  { %v1675_v49 = vmul.f32 %v1673_v41, %v1666_v48 }
0x249b   :  { %1677 = vrot.lane.b32.xlu0 %v1675_v49, %s2351_s5 }
0x250d   :  { %v1678_v0 = vpop.permute.xlu0 %1677 }
0x250e   :  { %v1680_v51 = vadd.f32 %v1678_v0, %v1670_v50 }
0x2510   :  { %2289 = vtanh.f32 %v1680_v51  ;;  %v1771_v1 = vrot.slane %v1680_v51, 6 }
0x251d   :  { %v2290_v13 = vpop.eup %2289 }
0x251e   :  { %1683 = vrot.lane.b32.xlu1 %v2290_v13, %s2350_s30 }
0x2590   :  { %v1684_v43 = vpop.permute.xlu1 %1683 }
0x2591   :  { %v1686_v52 = vmul.f32 %v1684_v43, %v1666_v48 }
0x2593   :  { %v1688_v53 = vrot.slane %v1686_v52, 2  ;;  %v1896_v8 = vsel %vm968_vm4, %v1584_v29, %v1686_v52 }
0x2595   :  { %1689 = vrot.lane.b32.xlu0 %v1688_v53, %s2351_s5 }
0x2607   :  { %v1690_v54 = vpop.permute.xlu0 %1689 }
0x2608   :  { %2213 = vmatmul.mubr.msk.f32.vlgmr.msra.gmra.mxu0 %vm74_vm3, %v1690_v54 }
0x26c8   :  { %v1759_v55 = vpop.f32.mrf.mxu0 }
0x26c9   :  { %v1764_v56 = vrot.slane %v1759_v55, 4 }
0x26ca   :  { %v2214_v57 = vpop.f32.mrf.mxu0 }
0x26cb   :  { %v1766_v58 = vadd.f32 %v1764_v56, %v2691_v26 }
0x26cd   :  { %2291 = vtanh.f32 %v1766_v58 }
0x26da   :  { %v2292_v60 = vpop.eup %2291 }
0x26db   :  { %1775 = vrot.lane.b32.xlu1 %v2292_v60, %s2350_s30  ;;  %v1768_v61 = vadd.f32 1.0, %v2292_v60 }
0x26dd   :  { %v1769_v62 = vmul.f32 0.5, %v1768_v61 }
0x26df   :  { %v1773_v2 = vmul.f32 %v1771_v1, %v1769_v62 }
0x274d   :  { %v1776_v16 = vpop.permute.xlu1 %1775 }
0x274e   :  { %v1778_v63 = vmul.f32 %v1776_v16, %v1769_v62 }
0x2750   :  { %1780 = vrot.lane.b32.xlu0 %v1778_v63, %s2351_s5 }
0x27c2   :  { %v1781_v19 = vpop.permute.xlu0 %1780 }
0x27c3   :  { %v1783_v3 = vadd.f32 %v1781_v19, %v1773_v2 }
0x27c5   :  { %2293 = vtanh.f32 %v1783_v3  ;;  %v1874_v28 = vrot.slane %v1783_v3, 6 }
0x27d2   :  { %v2294_v4 = vpop.eup %2293 }
0x27d3   :  { %1786 = vrot.lane.b32.xlu1 %v2294_v4, %s2350_s30 }
0x2845   :  { %v1787_v5 = vpop.permute.xlu1 %1786 }
0x2846   :  { %v1789_v7 = vmul.f32 %v1787_v5, %v1769_v62 }
0x2848   :  { %v1791_v10 = vrot.slane %v1789_v7, 4  ;;  %v1897_v11 = vsel %vm970_vm5, %v1896_v8, %v1789_v7 }
0x284a   :  { %1792 = vrot.lane.b32.xlu0 %v1791_v10, %s2351_s5 }
0x28bc   :  { %v1793_v12 = vpop.permute.xlu0 %1792 }
0x28bd   :  { %2224 = vmatmul.mubr.msk.f32.vlgmr.msra.gmra.mxu1 %vm74_vm3, %v1793_v12 }
0x297d   :  { %v1862_v14 = vpop.f32.mrf.mxu1 }
0x297e   :  { %v1867_v15 = vrot.slane %v1862_v14, 2 }
0x297f   :  { %v2225_v17 = vpop.f32.mrf.mxu1 }
0x2980   :  { %v1869_v18 = vadd.f32 %v1867_v15, %v2691_v26 }
0x2982   :  { %2295 = vtanh.f32 %v1869_v18 }
0x298f   :  { %v2296_v20 = vpop.eup %2295 }
0x2990   :  { %1878 = vrot.lane.b32.xlu1 %v2296_v20, %s2350_s30  ;;  %v1871_v6 = vadd.f32 1.0, %v2296_v20 }
0x2992   :  { %v1872_v22 = vmul.f32 0.5, %v1871_v6 }
0x2994   :  { %v1876_v30 = vmul.f32 %v1874_v28, %v1872_v22 }
0x2a02   :  { %v1879_v25 = vpop.permute.xlu1 %1878 }
0x2a03   :  { %v1881_v27 = vmul.f32 %v1879_v25, %v1872_v22 }
0x2a05   :  { %1883 = vrot.lane.b32.xlu0 %v1881_v27, %s2351_s5 }
0x2a09   :  { %1901 = vrot.lane.b32.xlu0 %v2676_v23, %s2351_s5 }
0x2a77   :  { %v1884_v31 = vpop.permute.xlu0 %1883 }
0x2a78   :  { %v1886_v32 = vadd.f32 %v1884_v31, %v1876_v30 }
0x2a7a   :  { %2297 = vtanh.f32 %v1886_v32 }
0x2a7b   :  { %v1902_v33 = vpop.permute.xlu0 %1901 }
0x2a7c   :  { %1907 = vst.msk [vmem:[%s2742_s4] sm:$0xff] %vm74_vm3, %v1902_v33 }
0x2a87   :  { %v2298_v26 = vpop.eup %2297 }
0x2a88   :  { %1889 = vrot.lane.b32.xlu1 %v2298_v26, %s2350_s30 }
0x2afa   :  { %v1890_v34 = vpop.permute.xlu1 %1889 }
0x2afb   :  { %v1892_v35 = vmul.f32 %v1890_v34, %v1872_v22 }
0x2afd   :  { %v1898_v36 = vsel %vm972_vm6, %v1897_v11, %v1892_v35 }
0x2afe   :  { %1903 = vrot.lane.b32.xlu1 %v1898_v36, %s2351_s5 }
0x2b70   :  { %v1904_v23 = vpop.permute.xlu1 %1903 }
0x2b71   :  { %1908 = vst.msk [vmem:[%s2742_s4 + $0x8] sm:$0xff] %vm74_vm3, %v1904_v23 }
0x2b72   :  { %1913 = vsyncpa [#allocation3], 1 }
0x2b73   :  { %1914 = vsyncpa [#allocation5], 1 }

</bundles_post_ra>
